<compile_context>
chip_gen: v6e
topology: v6e:2x2x1
jax: 0.10.0
libtpu: 0.0.40
codegen_flags: <defaults>
</compile_context>

<pallas_src>
import functools
import math

import jax
import jax.numpy as jnp
from jax import lax
from jax.experimental import pallas as pl
from jax.experimental.pallas import tpu as pltpu


def _dot(a, b, dt=None):
    if dt is not None:
        a = a.astype(dt)
        b = b.astype(dt)
    return jnp.dot(a, b, preferred_element_type=jnp.float32)


def _dot_nt(a, b, dt=None):
    # (M, D) x (N, D) -> (M, N), contracting last dims (rhs-transposed matmul)
    if dt is not None:
        a = a.astype(dt)
        b = b.astype(dt)
    return lax.dot_general(a, b, (((1,), (1,)), ((), ())),
                           preferred_element_type=jnp.float32)


def _dot_tn(a, b, dt=None):
    # (K, M) x (K, N) -> (M, N), contracting first dims (lhs-transposed matmul)
    if dt is not None:
        a = a.astype(dt)
        b = b.astype(dt)
    return lax.dot_general(a, b, (((0,), (0,)), ((), ())),
                           preferred_element_type=jnp.float32)


def _layernorm(x, w, b, eps=1e-5):
    mu = jnp.mean(x, axis=-1, keepdims=True)
    var = jnp.mean((x - mu) ** 2, axis=-1, keepdims=True)
    return (x - mu) * lax.rsqrt(var + eps) * w + b


def _head_softmax(logits, headmask, H, M):
    """Per-head (segment) softmax over columns h*M..(h+1)*M of `logits` (rows, H*M).

    Per-head max shift (not a shared row max) so no head segment can underflow because of
    another head's large logits; segment sums via a 0/1 headmask matmul; divide on the EUP.
    """
    NEG = jnp.float32(-1e30)
    seg_max = jnp.zeros_like(logits)
    for h in range(H):
        sel = headmask[h * M:h * M + 1, :]                      # (1, H*M) head-h columns
        mh = jnp.max(jnp.where(sel > 0, logits, NEG), axis=-1, keepdims=True)
        seg_max = seg_max + mh * sel
    e = jnp.exp(logits - seg_max)
    seg = _dot(e, headmask)                                     # per-head sums, broadcast back
    return e * pl.reciprocal(seg, approx=True)


def slice_attention_kernel(
    x_ref, wx_ref, qkvw_ref, mhaow_ref, outw_ref,
    vec_ref, headmask_ref, blockmask_ref, collapse_ref,
    o_ref,
    *, H, M, D, N, C, BT, mxu_dtype,
):
    HM = H * M
    dt = mxu_dtype

    x = x_ref[...]                                   # (BT*N, C)
    vec = vec_ref[...]                               # (9, PAD) coalesced bias / LN slab
    headmask = headmask_ref[...]                     # (HM, HM) same-head 0/1
    blockmask = blockmask_ref[...]                   # (HM, C)  head-row vs channel-block 0/1
    collapse = collapse_ref[...]                     # (M, HM)  head-collapse 0/1

    b_x = vec[0:1, :HM + C]
    qkv_b = vec[1:2, :3 * C]
    ln1_w, ln1_b = vec[2:3, :C], vec[3:4, :C]
    alpha = vec[4:5, :C]
    ln2_w, ln2_b = vec[5:6, :C], vec[6:7, :C]
    mhao_b = vec[7:8, :C]
    out_b = vec[8:9, :]                              # (1, PAD)

    # ---- fused (folded) score chain + value projection: one matmul for both ----
    xall = _dot(x, wx_ref[...], dt) + b_x            # (BT*N, HM + C)
    mixed = xall[:, :HM]                             # == (xk @ wtq_blockdiag) @ mix.T
    xv = xall[:, HM:]                                # value projection

    # ---- softmax over slices (M) within each head, batch-folded rows ----
    w_rows = _head_softmax(mixed, headmask, H, M)    # (BT*N, HM): [b*N+n, h*M+m]

    # ---- per-batch slice tokens: normalized weights^T @ xv, block-diag select ----
    st_parts = []
    for b in range(BT):
        w_t = w_rows[b * N:(b + 1) * N, :]           # (N, HM) == slice_weights^T
        xv_b = xv[b * N:(b + 1) * N, :]              # (N, C)
        csum = jnp.sum(w_t, axis=0, keepdims=True) + 1e-5
        w_n = w_t / csum                             # exact divide (matches reference eps)
        tok_all = _dot_tn(w_n, xv_b, dt) * blockmask # (HM, C)
        st_parts.append(_dot(collapse, tok_all))     # (M, C): head collapse on the MXU
    st = st_parts[0] if BT == 1 else jnp.concatenate(st_parts, axis=0)   # (BT*M, C)

    # ---- LayerNorm 1 + fused qkv projection (batch-folded rows) ----
    st = _layernorm(st, ln1_w, ln1_b)
    qkv = _dot(st, qkvw_ref[...], dt) + qkv_b        # (BT*M, 3C)
    q, k, v = qkv[:, :C], qkv[:, C:2 * C], qkv[:, 2 * C:]
    scale = D ** (-0.5)

    # ---- per-batch MHA over the M slice tokens, all heads via block-diag K/V ----
    mha_parts = []
    for b in range(BT):
        qb = q[b * M:(b + 1) * M, :]
        kb = k[b * M:(b + 1) * M, :]
        vb = v[b * M:(b + 1) * M, :]
        k_bd = jnp.concatenate([kb] * H, axis=0) * blockmask     # (HM, C) block-diag K
        v_bd = jnp.concatenate([vb] * H, axis=0) * blockmask     # (HM, C) block-diag V
        s = _dot_nt(qb, k_bd, dt) * scale            # (M, HM): per-head scores
        att = _head_softmax(s, headmask, H, M)       # per-head softmax
        mha_parts.append(_dot(att, v_bd, dt))        # (M, C)
    mha = mha_parts[0] if BT == 1 else jnp.concatenate(mha_parts, axis=0)
    mha = _dot(mha, mhaow_ref[...], dt) + mhao_b     # (BT*M, C)

    # ---- residual-ish combine + LayerNorm 2 ----
    ot = _layernorm(st * alpha + mha, ln2_w, ln2_b)

    # ---- back-projection onto N tokens: w_t @ blockdiag(out_token) ----
    # TODO(synk): at large BT, stage w_rows in a VMEM scratch across the MHA section
    # instead of keeping it live in vregs (first source of spills when bt*N*HM grows).
    cat_parts = []
    for b in range(BT):
        ot_b = ot[b * M:(b + 1) * M, :]
        ot_bd = jnp.concatenate([ot_b] * H, axis=0) * blockmask  # (HM, C)
        cat_parts.append(_dot(w_rows[b * N:(b + 1) * N, :], ot_bd, dt))   # (N, C)
    cat = cat_parts[0] if BT == 1 else jnp.concatenate(cat_parts, axis=0)

    # ---- final out_proj, lane-dense (padded to 128 columns) store ----
    o_ref[...] = (_dot(cat, outw_ref[...], dt) + out_b).astype(o_ref.dtype)


def _round_up(v, m):
    return -(-v // m) * m


def _pick_bt(B, N):
    """Batch elements folded per grid step.

    Fold the whole batch into one grid step unless every step can get >= ~128 batch-folded
    rows AND there are >= 2 steps: the v7x 2-TC 'parallel' split only pays once per-step
    compute dwarfs the ~600-cycle fixed step cost; on single-TC v5e/v6e one big step wins.
    """
    cands = [bt for bt in range(1, B) if B % bt == 0 and bt * N >= 128]
    return min(cands) if cands else max(B, 1)


def slice_attention(x, p, *, H, M, bt=None, mxu_dtype=None):
    B, N, C = x.shape
    D = C // H
    HM = H * M
    PAD = _round_up(max(HM + C, 3 * C, 128), 128)    # lane-dense slab / output width

    # ---------------- host-side packing (pure layout work, negligible) ----------------
    wk_w, wv_w = p['wkv_w'][:, :C], p['wkv_w'][:, C:]
    wk_b, wv_b = p['wkv_b'][:, :C], p['wkv_b'][:, C:]

    # block-diagonal slice-query weight: w_scores[h*D+d, h*M+m] = wtq[h, m, d]
    eye_h = jnp.eye(H, dtype=p['wtq'].dtype)
    w_scores = jnp.einsum('hmd,hg->hdgm', p['wtq'], eye_h).reshape(C, HM)
    # fold xk -> scores -> mix into one (C, HM) weight (exact), fuse with value proj
    fold = w_scores @ p['mix_w'].T                              # (C, HM)
    w_x = jnp.concatenate([wk_w @ fold, wv_w], axis=1)          # (C, HM + C)
    b_x = jnp.concatenate([wk_b @ fold, wv_b], axis=1)          # (1, HM + C)

    out_w_pad = jnp.zeros((C, PAD), jnp.float32).at[:, :C].set(p['out_w'])
    out_b_pad = jnp.zeros((1, PAD), jnp.float32).at[:, :C].set(p['out_b'])

    def row(v):
        v = jnp.asarray(v, jnp.float32).reshape(1, -1)
        return jnp.pad(v, ((0, 0), (0, PAD - v.shape[1])))

    vec = jnp.concatenate([                                      # (9, PAD) bias / LN slab
        row(b_x), row(p['qkv_b']),
        row(p['ln1_w']), row(p['ln1_b']), row(p['alpha']),
        row(p['ln2_w']), row(p['ln2_b']), row(p['mhao_b']),
        out_b_pad], axis=0)

    row_head = jnp.arange(HM, dtype=jnp.int32) // M
    col_head = jnp.arange(C, dtype=jnp.int32) // D
    blockmask = (row_head[:, None] == col_head[None, :]).astype(jnp.float32)   # (HM, C)
    headmask = (row_head[:, None] == row_head[None, :]).astype(jnp.float32)    # (HM, HM)
    collapse = (jnp.arange(M, dtype=jnp.int32)[:, None]
                == (jnp.arange(HM, dtype=jnp.int32) % M)[None, :]).astype(jnp.float32)

    if bt is None:
        bt = _pick_bt(B, N)
    assert B % bt == 0

    args = [w_x, p['qkv_w'], p['mhao_w'], out_w_pad, vec, headmask, blockmask, collapse]
    weight_bytes = sum(int(a.size) * 4 for a in args)
    # double-buffered in/out blocks + (buffered) weights + headroom; clamp for v7x 64 MiB
    vmem_limit = int(min(max(2 * bt * N * (C + PAD) * 4 + 2 * weight_bytes + (8 << 20),
                             16 << 20), 48 << 20))

    in_specs = [pl.BlockSpec((bt * N, C), lambda i: (i, 0))] + [
        pl.BlockSpec(a.shape, lambda i, _nd=a.ndim: (0,) * _nd) for a in args]

    kernel = functools.partial(slice_attention_kernel, H=H, M=M, D=D, N=N, C=C,
                               BT=bt, mxu_dtype=mxu_dtype)
    out2 = pl.pallas_call(
        kernel,
        out_shape=jax.ShapeDtypeStruct((B * N, PAD), jnp.float32),
        grid_spec=pltpu.PrefetchScalarGridSpec(
            num_scalar_prefetch=0,
            grid=(B // bt,),
            in_specs=in_specs,
            out_specs=pl.BlockSpec((bt * N, PAD), lambda i: (i, 0)),
        ),
        compiler_params=pltpu.CompilerParams(
            dimension_semantics=("parallel",),
            vmem_limit_bytes=vmem_limit,
        ),
    )(x.reshape(B * N, C), *args)
    return out2[:, :C].reshape(B, N, C)


# ------------------- pure-JAX reference (for verification) -------------------
def reference(x, p, H, M):
    B, N, C = x.shape
    D = C // H
    kv = x @ p['wkv_w'] + p['wkv_b']
    xk, xv = kv[..., :C], kv[..., C:]
    xk = xk.reshape(B, N, H, D).transpose(0, 2, 1, 3)
    xv = xv.reshape(B, N, H, D).transpose(0, 2, 1, 3)
    scores = jnp.einsum('hmd,bhnd->bhmn', p['wtq'], xk)
    scores = jnp.einsum('ij,bjn->bin', p['mix_w'],
                        scores.reshape(B, H * M, N)).reshape(B, H, M, N)
    w = jax.nn.softmax(scores, axis=-2)
    tok = jnp.einsum('bhmn,bhnd->bhmd', w, xv)
    tok = tok / (w.sum(-1, keepdims=True) + 1e-5)
    tok = tok.transpose(0, 2, 1, 3).reshape(B, M, C)
    tok = _layernorm(tok, p['ln1_w'], p['ln1_b'])
    qkv = tok @ p['qkv_w'] + p['qkv_b']
    q, k, v = qkv[..., :C], qkv[..., C:2 * C], qkv[..., 2 * C:]
    heads = lambda t: t.reshape(B, M, H, D).transpose(0, 2, 1, 3)
    q, k, v = heads(q), heads(k), heads(v)
    att = jax.nn.softmax(jnp.einsum('bhqd,bhkd->bhqk', q, k) * D ** (-0.5), axis=-1)
    mo = jnp.einsum('bhqk,bhkd->bhqd', att, v).transpose(0, 2, 1, 3).reshape(B, M, C)
    mo = mo @ p['mhao_w'] + p['mhao_b']
    ot = _layernorm(tok * p['alpha'] + mo, p['ln2_w'], p['ln2_b'])
    ot = ot.reshape(B, M, H, D).transpose(0, 2, 1, 3)
    out = jnp.einsum('bhmd,bhmn->bhnd', ot, w)
    out = out.transpose(0, 2, 1, 3).reshape(B, N, C)
    return out @ p['out_w'] + p['out_b']


if __name__ == "__main__":
    B, N, C, H, M = 2, 16, 32, 4, 8          # batch, seq, hidden, heads, slices
    D = C // H

    key = jax.random.PRNGKey(0)
    keys = jax.random.split(key, 12)

    def u(k, shape, scale):
        return jax.random.uniform(k, shape, jnp.float32, -scale, scale)

    params = dict(
        wkv_w=u(keys[0], (C, 2 * C), 1 / math.sqrt(C)),
        wkv_b=u(keys[1], (1, 2 * C), 1 / math.sqrt(C)),
        wtq=0.1 * jax.random.normal(keys[2], (H, M, D), jnp.float32),
        mix_w=u(keys[3], (H * M, H * M), 1 / math.sqrt(H * M)),
        ln1_w=jnp.ones((1, C), jnp.float32), ln1_b=jnp.zeros((1, C), jnp.float32),
        ln2_w=jnp.ones((1, C), jnp.float32), ln2_b=jnp.zeros((1, C), jnp.float32),
        qkv_w=u(keys[4], (C, 3 * C), 1 / math.sqrt(C)),
        qkv_b=u(keys[5], (1, 3 * C), 1 / math.sqrt(C)),
        mhao_w=u(keys[6], (C, C), 1 / math.sqrt(C)),
        mhao_b=u(keys[7], (1, C), 1 / math.sqrt(C)),
        out_w=u(keys[8], (C, C), 1 / math.sqrt(C)),
        out_b=u(keys[9], (1, C), 1 / math.sqrt(C)),
        alpha=jnp.ones((1, C), jnp.float32),
    )
    # NOTE: gn1/gn2 from the PyTorch module are unused in its forward(), so they are omitted.

    x = jax.random.normal(keys[10], (B, N, C), jnp.float32)

    # mxu_dtype=jnp.bfloat16 is the production setting on v6e/v7x (MXU operands only,
    # f32 accumulate); kept at f32 here so the small-shape numerical check is tight.
    out = slice_attention(x, params, H=H, M=M)
    out = jax.block_until_ready(out)

    ref = reference(x, params, H, M)
    assert out.shape == (B, N, C)
    max_err = float(jnp.max(jnp.abs(out - ref)))
    assert bool(jnp.allclose(out, ref, rtol=1e-2, atol=1e-2)), f"max_err={max_err}"

    print("KERNEL_OK")
</pallas_src>

<mosaic_0001>
module attributes {stable_mosaic.version = 11 : i64} {
  func.func @slice_attention_kernel(%arg0: i32, %arg1: memref<32x32xf32, #tpu.memory_space<vmem>>, %arg2: memref<32x64xf32, #tpu.memory_space<vmem>>, %arg3: memref<32x96xf32, #tpu.memory_space<vmem>>, %arg4: memref<32x32xf32, #tpu.memory_space<vmem>>, %arg5: memref<32x128xf32, #tpu.memory_space<vmem>>, %arg6: memref<9x128xf32, #tpu.memory_space<vmem>>, %arg7: memref<32x32xf32, #tpu.memory_space<vmem>>, %arg8: memref<32x32xf32, #tpu.memory_space<vmem>>, %arg9: memref<8x32xf32, #tpu.memory_space<vmem>>, %arg10: memref<32x128xf32, #tpu.memory_space<vmem>>) attributes {dimension_semantics = [#tpu.dimension_semantics<parallel>], iteration_bounds = array<i64: 1>, scalar_prefetch = 0 : i64, scratch_operands = 0 : i64, tpu.core_type = #tpu.core_type<tc>, window_params = [{transform_indices = @transform_0, window_bounds = array<i64: 32, 32>}, {pipeline_mode = #tpu.pipeline_mode<synchronous>, transform_indices = @transform_1, window_bounds = array<i64: 32, 64>}, {pipeline_mode = #tpu.pipeline_mode<synchronous>, transform_indices = @transform_2, window_bounds = array<i64: 32, 96>}, {pipeline_mode = #tpu.pipeline_mode<synchronous>, transform_indices = @transform_3, window_bounds = array<i64: 32, 32>}, {pipeline_mode = #tpu.pipeline_mode<synchronous>, transform_indices = @transform_4, window_bounds = array<i64: 32, 128>}, {pipeline_mode = #tpu.pipeline_mode<synchronous>, transform_indices = @transform_5, window_bounds = array<i64: 9, 128>}, {pipeline_mode = #tpu.pipeline_mode<synchronous>, transform_indices = @transform_6, window_bounds = array<i64: 32, 32>}, {pipeline_mode = #tpu.pipeline_mode<synchronous>, transform_indices = @transform_7, window_bounds = array<i64: 32, 32>}, {pipeline_mode = #tpu.pipeline_mode<synchronous>, transform_indices = @transform_8, window_bounds = array<i64: 8, 32>}, {transform_indices = @transform_9, window_bounds = array<i64: 32, 128>}]} {
    %c0 = arith.constant 0 : index
    %c0_0 = arith.constant 0 : index
    %0 = vector.load %arg1[%c0, %c0_0] : memref<32x32xf32, #tpu.memory_space<vmem>>, vector<32x32xf32>
    %c0_1 = arith.constant 0 : index
    %c0_2 = arith.constant 0 : index
    %1 = vector.load %arg6[%c0_1, %c0_2] : memref<9x128xf32, #tpu.memory_space<vmem>>, vector<9x128xf32>
    %c0_3 = arith.constant 0 : index
    %c0_4 = arith.constant 0 : index
    %2 = vector.load %arg7[%c0_3, %c0_4] : memref<32x32xf32, #tpu.memory_space<vmem>>, vector<32x32xf32>
    %c0_5 = arith.constant 0 : index
    %c0_6 = arith.constant 0 : index
    %3 = vector.load %arg8[%c0_5, %c0_6] : memref<32x32xf32, #tpu.memory_space<vmem>>, vector<32x32xf32>
    %c0_7 = arith.constant 0 : index
    %c0_8 = arith.constant 0 : index
    %4 = vector.load %arg9[%c0_7, %c0_8] : memref<8x32xf32, #tpu.memory_space<vmem>>, vector<8x32xf32>
    %5 = vector.extract_strided_slice %1 {offsets = [0, 0], sizes = [1, 64], strides = [1, 1]} : vector<9x128xf32> to vector<1x64xf32>
    %6 = vector.extract_strided_slice %1 {offsets = [1, 0], sizes = [1, 96], strides = [1, 1]} : vector<9x128xf32> to vector<1x96xf32>
    %7 = vector.extract_strided_slice %1 {offsets = [2, 0], sizes = [1, 32], strides = [1, 1]} : vector<9x128xf32> to vector<1x32xf32>
    %8 = vector.extract_strided_slice %1 {offsets = [3, 0], sizes = [1, 32], strides = [1, 1]} : vector<9x128xf32> to vector<1x32xf32>
    %9 = vector.extract_strided_slice %1 {offsets = [4, 0], sizes = [1, 32], strides = [1, 1]} : vector<9x128xf32> to vector<1x32xf32>
    %10 = vector.extract_strided_slice %1 {offsets = [5, 0], sizes = [1, 32], strides = [1, 1]} : vector<9x128xf32> to vector<1x32xf32>
    %11 = vector.extract_strided_slice %1 {offsets = [6, 0], sizes = [1, 32], strides = [1, 1]} : vector<9x128xf32> to vector<1x32xf32>
    %12 = vector.extract_strided_slice %1 {offsets = [7, 0], sizes = [1, 32], strides = [1, 1]} : vector<9x128xf32> to vector<1x32xf32>
    %13 = vector.extract_strided_slice %1 {offsets = [8, 0], sizes = [1, 128], strides = [1, 1]} : vector<9x128xf32> to vector<1x128xf32>
    %c0_9 = arith.constant 0 : index
    %c0_10 = arith.constant 0 : index
    %14 = vector.load %arg2[%c0_9, %c0_10] : memref<32x64xf32, #tpu.memory_space<vmem>>, vector<32x64xf32>
    %cst = arith.constant dense<0.000000e+00> : vector<32x64xf32>
    %15 = tpu.matmul %0, %14, %cst {dimension_numbers = #tpu.dot_dimension_numbers<[1], [0], [0], [1], [0, 0, 1, 1], [], []>} : vector<32x32xf32>, vector<32x64xf32>, vector<32x64xf32> -> vector<32x64xf32>
    %16 = vector.broadcast %5 : vector<1x64xf32> to vector<32x64xf32>
    %17 = arith.addf %15, %16 : vector<32x64xf32>
    %18 = vector.extract_strided_slice %17 {offsets = [0, 0], sizes = [32, 32], strides = [1, 1]} : vector<32x64xf32> to vector<32x32xf32>
    %19 = vector.extract_strided_slice %17 {offsets = [0, 32], sizes = [32, 32], strides = [1, 1]} : vector<32x64xf32> to vector<32x32xf32>
    %cst_11 = arith.constant 0.000000e+00 : f32
    %20 = vector.broadcast %cst_11 : f32 to vector<32x32xf32>
    %21 = vector.extract_strided_slice %2 {offsets = [0, 0], sizes = [1, 32], strides = [1, 1]} : vector<32x32xf32> to vector<1x32xf32>
    %cst_12 = arith.constant 0.000000e+00 : f32
    %22 = vector.broadcast %cst_12 : f32 to vector<1x32xf32>
    %23 = arith.cmpf ogt, %21, %22 : vector<1x32xf32>
    %cst_13 = arith.constant -1.000000e+30 : f32
    %24 = vector.shape_cast %23 : vector<1x32xi1> to vector<1x32xi1>
    %25 = vector.broadcast %24 : vector<1x32xi1> to vector<32x32xi1>
    %26 = vector.broadcast %cst_13 : f32 to vector<32x32xf32>
    %27 = arith.select %25, %18, %26 : vector<32x32xi1>, vector<32x32xf32>
    %cst_14 = arith.constant dense<0xFF800000> : vector<32xf32>
    %28 = vector.multi_reduction <maximumf>, %27, %cst_14 [1] : vector<32x32xf32> to vector<32xf32>
    %29 = vector.shape_cast %28 : vector<32xf32> to vector<32x1xf32>
    %30 = vector.broadcast %29 : vector<32x1xf32> to vector<32x32xf32>
    %31 = vector.broadcast %21 : vector<1x32xf32> to vector<32x32xf32>
    %32 = arith.mulf %30, %31 : vector<32x32xf32>
    %33 = arith.addf %20, %32 : vector<32x32xf32>
    %34 = vector.extract_strided_slice %2 {offsets = [8, 0], sizes = [1, 32], strides = [1, 1]} : vector<32x32xf32> to vector<1x32xf32>
    %cst_15 = arith.constant 0.000000e+00 : f32
    %35 = vector.broadcast %cst_15 : f32 to vector<1x32xf32>
    %36 = arith.cmpf ogt, %34, %35 : vector<1x32xf32>
    %cst_16 = arith.constant -1.000000e+30 : f32
    %37 = vector.shape_cast %36 : vector<1x32xi1> to vector<1x32xi1>
    %38 = vector.broadcast %37 : vector<1x32xi1> to vector<32x32xi1>
    %39 = vector.broadcast %cst_16 : f32 to vector<32x32xf32>
    %40 = arith.select %38, %18, %39 : vector<32x32xi1>, vector<32x32xf32>
    %cst_17 = arith.constant dense<0xFF800000> : vector<32xf32>
    %41 = vector.multi_reduction <maximumf>, %40, %cst_17 [1] : vector<32x32xf32> to vector<32xf32>
    %42 = vector.shape_cast %41 : vector<32xf32> to vector<32x1xf32>
    %43 = vector.broadcast %42 : vector<32x1xf32> to vector<32x32xf32>
    %44 = vector.broadcast %34 : vector<1x32xf32> to vector<32x32xf32>
    %45 = arith.mulf %43, %44 : vector<32x32xf32>
    %46 = arith.addf %33, %45 : vector<32x32xf32>
    %47 = vector.extract_strided_slice %2 {offsets = [16, 0], sizes = [1, 32], strides = [1, 1]} : vector<32x32xf32> to vector<1x32xf32>
    %cst_18 = arith.constant 0.000000e+00 : f32
    %48 = vector.broadcast %cst_18 : f32 to vector<1x32xf32>
    %49 = arith.cmpf ogt, %47, %48 : vector<1x32xf32>
    %cst_19 = arith.constant -1.000000e+30 : f32
    %50 = vector.shape_cast %49 : vector<1x32xi1> to vector<1x32xi1>
    %51 = vector.broadcast %50 : vector<1x32xi1> to vector<32x32xi1>
    %52 = vector.broadcast %cst_19 : f32 to vector<32x32xf32>
    %53 = arith.select %51, %18, %52 : vector<32x32xi1>, vector<32x32xf32>
    %cst_20 = arith.constant dense<0xFF800000> : vector<32xf32>
    %54 = vector.multi_reduction <maximumf>, %53, %cst_20 [1] : vector<32x32xf32> to vector<32xf32>
    %55 = vector.shape_cast %54 : vector<32xf32> to vector<32x1xf32>
    %56 = vector.broadcast %55 : vector<32x1xf32> to vector<32x32xf32>
    %57 = vector.broadcast %47 : vector<1x32xf32> to vector<32x32xf32>
    %58 = arith.mulf %56, %57 : vector<32x32xf32>
    %59 = arith.addf %46, %58 : vector<32x32xf32>
    %60 = vector.extract_strided_slice %2 {offsets = [24, 0], sizes = [1, 32], strides = [1, 1]} : vector<32x32xf32> to vector<1x32xf32>
    %cst_21 = arith.constant 0.000000e+00 : f32
    %61 = vector.broadcast %cst_21 : f32 to vector<1x32xf32>
    %62 = arith.cmpf ogt, %60, %61 : vector<1x32xf32>
    %cst_22 = arith.constant -1.000000e+30 : f32
    %63 = vector.shape_cast %62 : vector<1x32xi1> to vector<1x32xi1>
    %64 = vector.broadcast %63 : vector<1x32xi1> to vector<32x32xi1>
    %65 = vector.broadcast %cst_22 : f32 to vector<32x32xf32>
    %66 = arith.select %64, %18, %65 : vector<32x32xi1>, vector<32x32xf32>
    %cst_23 = arith.constant dense<0xFF800000> : vector<32xf32>
    %67 = vector.multi_reduction <maximumf>, %66, %cst_23 [1] : vector<32x32xf32> to vector<32xf32>
    %68 = vector.shape_cast %67 : vector<32xf32> to vector<32x1xf32>
    %69 = vector.broadcast %68 : vector<32x1xf32> to vector<32x32xf32>
    %70 = vector.broadcast %60 : vector<1x32xf32> to vector<32x32xf32>
    %71 = arith.mulf %69, %70 : vector<32x32xf32>
    %72 = arith.addf %59, %71 : vector<32x32xf32>
    %73 = arith.subf %18, %72 : vector<32x32xf32>
    %74 = math.exp %73 : vector<32x32xf32>
    %cst_24 = arith.constant dense<0.000000e+00> : vector<32x32xf32>
    %75 = tpu.matmul %74, %2, %cst_24 {dimension_numbers = #tpu.dot_dimension_numbers<[1], [0], [0], [1], [0, 0, 1, 1], [], []>} : vector<32x32xf32>, vector<32x32xf32>, vector<32x32xf32> -> vector<32x32xf32>
    %76 = tpu.reciprocal %75 {approx = true} : vector<32x32xf32> -> vector<32x32xf32>
    %77 = arith.mulf %74, %76 : vector<32x32xf32>
    %78 = vector.extract_strided_slice %77 {offsets = [0, 0], sizes = [16, 32], strides = [1, 1]} : vector<32x32xf32> to vector<16x32xf32>
    %79 = vector.extract_strided_slice %19 {offsets = [0, 0], sizes = [16, 32], strides = [1, 1]} : vector<32x32xf32> to vector<16x32xf32>
    %cst_25 = arith.constant dense<0.000000e+00> : vector<32xf32>
    %80 = vector.multi_reduction <add>, %78, %cst_25 [0] : vector<16x32xf32> to vector<32xf32>
    %81 = vector.shape_cast %80 : vector<32xf32> to vector<1x32xf32>
    %cst_26 = arith.constant 9.99999974E-6 : f32
    %82 = vector.broadcast %cst_26 : f32 to vector<1x32xf32>
    %83 = arith.addf %81, %82 : vector<1x32xf32>
    %84 = vector.broadcast %83 : vector<1x32xf32> to vector<16x32xf32>
    %85 = arith.divf %78, %84 : vector<16x32xf32>
    %cst_27 = arith.constant dense<0.000000e+00> : vector<32x32xf32>
    %86 = tpu.matmul %85, %79, %cst_27 {dimension_numbers = #tpu.dot_dimension_numbers<[0], [0], [1], [1], [0, 1, 1, 1], [], []>} : vector<16x32xf32>, vector<16x32xf32>, vector<32x32xf32> -> vector<32x32xf32>
    %87 = arith.mulf %86, %3 : vector<32x32xf32>
    %cst_28 = arith.constant dense<0.000000e+00> : vector<8x32xf32>
    %88 = tpu.matmul %4, %87, %cst_28 {dimension_numbers = #tpu.dot_dimension_numbers<[1], [0], [0], [1], [0, 0, 1, 1], [], []>} : vector<8x32xf32>, vector<32x32xf32>, vector<8x32xf32> -> vector<8x32xf32>
    %89 = vector.extract_strided_slice %77 {offsets = [16, 0], sizes = [16, 32], strides = [1, 1]} : vector<32x32xf32> to vector<16x32xf32>
    %90 = vector.extract_strided_slice %19 {offsets = [16, 0], sizes = [16, 32], strides = [1, 1]} : vector<32x32xf32> to vector<16x32xf32>
    %cst_29 = arith.constant dense<0.000000e+00> : vector<32xf32>
    %91 = vector.multi_reduction <add>, %89, %cst_29 [0] : vector<16x32xf32> to vector<32xf32>
    %92 = vector.shape_cast %91 : vector<32xf32> to vector<1x32xf32>
    %cst_30 = arith.constant 9.99999974E-6 : f32
    %93 = vector.broadcast %cst_30 : f32 to vector<1x32xf32>
    %94 = arith.addf %92, %93 : vector<1x32xf32>
    %95 = vector.broadcast %94 : vector<1x32xf32> to vector<16x32xf32>
    %96 = arith.divf %89, %95 : vector<16x32xf32>
    %cst_31 = arith.constant dense<0.000000e+00> : vector<32x32xf32>
    %97 = tpu.matmul %96, %90, %cst_31 {dimension_numbers = #tpu.dot_dimension_numbers<[0], [0], [1], [1], [0, 1, 1, 1], [], []>} : vector<16x32xf32>, vector<16x32xf32>, vector<32x32xf32> -> vector<32x32xf32>
    %98 = arith.mulf %97, %3 : vector<32x32xf32>
    %cst_32 = arith.constant dense<0.000000e+00> : vector<8x32xf32>
    %99 = tpu.matmul %4, %98, %cst_32 {dimension_numbers = #tpu.dot_dimension_numbers<[1], [0], [0], [1], [0, 0, 1, 1], [], []>} : vector<8x32xf32>, vector<32x32xf32>, vector<8x32xf32> -> vector<8x32xf32>
    %100 = tpu.concatenate %88, %99 in 0 : vector<8x32xf32>, vector<8x32xf32> -> vector<16x32xf32>
    %cst_33 = arith.constant dense<0.000000e+00> : vector<16xf32>
    %101 = vector.multi_reduction <add>, %100, %cst_33 [1] : vector<16x32xf32> to vector<16xf32>
    %102 = vector.shape_cast %101 : vector<16xf32> to vector<16x1xf32>
    %cst_34 = arith.constant 3.200000e+01 : f32
    %103 = vector.broadcast %cst_34 : f32 to vector<16x1xf32>
    %104 = arith.divf %102, %103 : vector<16x1xf32>
    %105 = vector.broadcast %104 : vector<16x1xf32> to vector<16x32xf32>
    %106 = arith.subf %100, %105 : vector<16x32xf32>
    %107 = arith.mulf %106, %106 : vector<16x32xf32>
    %cst_35 = arith.constant dense<0.000000e+00> : vector<16xf32>
    %108 = vector.multi_reduction <add>, %107, %cst_35 [1] : vector<16x32xf32> to vector<16xf32>
    %109 = vector.shape_cast %108 : vector<16xf32> to vector<16x1xf32>
    %cst_36 = arith.constant 3.200000e+01 : f32
    %110 = vector.broadcast %cst_36 : f32 to vector<16x1xf32>
    %111 = arith.divf %109, %110 : vector<16x1xf32>
    %112 = vector.broadcast %104 : vector<16x1xf32> to vector<16x32xf32>
    %113 = arith.subf %100, %112 : vector<16x32xf32>
    %cst_37 = arith.constant 9.99999974E-6 : f32
    %114 = vector.broadcast %cst_37 : f32 to vector<16x1xf32>
    %115 = arith.addf %111, %114 : vector<16x1xf32>
    %116 = math.rsqrt %115 : vector<16x1xf32>
    %117 = vector.broadcast %116 : vector<16x1xf32> to vector<16x32xf32>
    %118 = arith.mulf %113, %117 : vector<16x32xf32>
    %119 = vector.broadcast %7 : vector<1x32xf32> to vector<16x32xf32>
    %120 = arith.mulf %118, %119 : vector<16x32xf32>
    %121 = vector.broadcast %8 : vector<1x32xf32> to vector<16x32xf32>
    %122 = arith.addf %120, %121 : vector<16x32xf32>
    %c0_38 = arith.constant 0 : index
    %c0_39 = arith.constant 0 : index
    %123 = vector.load %arg3[%c0_38, %c0_39] : memref<32x96xf32, #tpu.memory_space<vmem>>, vector<32x96xf32>
    %cst_40 = arith.constant dense<0.000000e+00> : vector<16x96xf32>
    %124 = tpu.matmul %122, %123, %cst_40 {dimension_numbers = #tpu.dot_dimension_numbers<[1], [0], [0], [1], [0, 0, 1, 1], [], []>} : vector<16x32xf32>, vector<32x96xf32>, vector<16x96xf32> -> vector<16x96xf32>
    %125 = vector.broadcast %6 : vector<1x96xf32> to vector<16x96xf32>
    %126 = arith.addf %124, %125 : vector<16x96xf32>
    %127 = vector.extract_strided_slice %126 {offsets = [0, 0], sizes = [16, 32], strides = [1, 1]} : vector<16x96xf32> to vector<16x32xf32>
    %128 = vector.extract_strided_slice %126 {offsets = [0, 32], sizes = [16, 32], strides = [1, 1]} : vector<16x96xf32> to vector<16x32xf32>
    %129 = vector.extract_strided_slice %126 {offsets = [0, 64], sizes = [16, 32], strides = [1, 1]} : vector<16x96xf32> to vector<16x32xf32>
    %130 = vector.extract_strided_slice %127 {offsets = [0, 0], sizes = [8, 32], strides = [1, 1]} : vector<16x32xf32> to vector<8x32xf32>
    %131 = vector.extract_strided_slice %128 {offsets = [0, 0], sizes = [8, 32], strides = [1, 1]} : vector<16x32xf32> to vector<8x32xf32>
    %132 = vector.extract_strided_slice %129 {offsets = [0, 0], sizes = [8, 32], strides = [1, 1]} : vector<16x32xf32> to vector<8x32xf32>
    %133 = tpu.concatenate %131, %131, %131, %131 in 0 : vector<8x32xf32>, vector<8x32xf32>, vector<8x32xf32>, vector<8x32xf32> -> vector<32x32xf32>
    %134 = arith.mulf %133, %3 : vector<32x32xf32>
    %135 = tpu.concatenate %132, %132, %132, %132 in 0 : vector<8x32xf32>, vector<8x32xf32>, vector<8x32xf32>, vector<8x32xf32> -> vector<32x32xf32>
    %136 = arith.mulf %135, %3 : vector<32x32xf32>
    %cst_41 = arith.constant dense<0.000000e+00> : vector<8x32xf32>
    %137 = tpu.matmul %130, %134, %cst_41 {dimension_numbers = #tpu.dot_dimension_numbers<[1], [1], [0], [0], [0, 0, 1, 0], [], []>} : vector<8x32xf32>, vector<32x32xf32>, vector<8x32xf32> -> vector<8x32xf32>
    %cst_42 = arith.constant 0.353553385 : f32
    %138 = vector.broadcast %cst_42 : f32 to vector<8x32xf32>
    %139 = arith.mulf %137, %138 : vector<8x32xf32>
    %cst_43 = arith.constant 0.000000e+00 : f32
    %140 = vector.broadcast %cst_43 : f32 to vector<8x32xf32>
    %141 = vector.extract_strided_slice %2 {offsets = [0, 0], sizes = [1, 32], strides = [1, 1]} : vector<32x32xf32> to vector<1x32xf32>
    %cst_44 = arith.constant 0.000000e+00 : f32
    %142 = vector.broadcast %cst_44 : f32 to vector<1x32xf32>
    %143 = arith.cmpf ogt, %141, %142 : vector<1x32xf32>
    %cst_45 = arith.constant -1.000000e+30 : f32
    %144 = vector.shape_cast %143 : vector<1x32xi1> to vector<1x32xi1>
    %145 = vector.broadcast %144 : vector<1x32xi1> to vector<8x32xi1>
    %146 = vector.broadcast %cst_45 : f32 to vector<8x32xf32>
    %147 = arith.select %145, %139, %146 : vector<8x32xi1>, vector<8x32xf32>
    %cst_46 = arith.constant dense<0xFF800000> : vector<8xf32>
    %148 = vector.multi_reduction <maximumf>, %147, %cst_46 [1] : vector<8x32xf32> to vector<8xf32>
    %149 = vector.shape_cast %148 : vector<8xf32> to vector<8x1xf32>
    %150 = vector.broadcast %149 : vector<8x1xf32> to vector<8x32xf32>
    %151 = vector.broadcast %141 : vector<1x32xf32> to vector<8x32xf32>
    %152 = arith.mulf %150, %151 : vector<8x32xf32>
    %153 = arith.addf %140, %152 : vector<8x32xf32>
    %154 = vector.extract_strided_slice %2 {offsets = [8, 0], sizes = [1, 32], strides = [1, 1]} : vector<32x32xf32> to vector<1x32xf32>
    %cst_47 = arith.constant 0.000000e+00 : f32
    %155 = vector.broadcast %cst_47 : f32 to vector<1x32xf32>
    %156 = arith.cmpf ogt, %154, %155 : vector<1x32xf32>
    %cst_48 = arith.constant -1.000000e+30 : f32
    %157 = vector.shape_cast %156 : vector<1x32xi1> to vector<1x32xi1>
    %158 = vector.broadcast %157 : vector<1x32xi1> to vector<8x32xi1>
    %159 = vector.broadcast %cst_48 : f32 to vector<8x32xf32>
    %160 = arith.select %158, %139, %159 : vector<8x32xi1>, vector<8x32xf32>
    %cst_49 = arith.constant dense<0xFF800000> : vector<8xf32>
    %161 = vector.multi_reduction <maximumf>, %160, %cst_49 [1] : vector<8x32xf32> to vector<8xf32>
    %162 = vector.shape_cast %161 : vector<8xf32> to vector<8x1xf32>
    %163 = vector.broadcast %162 : vector<8x1xf32> to vector<8x32xf32>
    %164 = vector.broadcast %154 : vector<1x32xf32> to vector<8x32xf32>
    %165 = arith.mulf %163, %164 : vector<8x32xf32>
    %166 = arith.addf %153, %165 : vector<8x32xf32>
    %167 = vector.extract_strided_slice %2 {offsets = [16, 0], sizes = [1, 32], strides = [1, 1]} : vector<32x32xf32> to vector<1x32xf32>
    %cst_50 = arith.constant 0.000000e+00 : f32
    %168 = vector.broadcast %cst_50 : f32 to vector<1x32xf32>
    %169 = arith.cmpf ogt, %167, %168 : vector<1x32xf32>
    %cst_51 = arith.constant -1.000000e+30 : f32
    %170 = vector.shape_cast %169 : vector<1x32xi1> to vector<1x32xi1>
    %171 = vector.broadcast %170 : vector<1x32xi1> to vector<8x32xi1>
    %172 = vector.broadcast %cst_51 : f32 to vector<8x32xf32>
    %173 = arith.select %171, %139, %172 : vector<8x32xi1>, vector<8x32xf32>
    %cst_52 = arith.constant dense<0xFF800000> : vector<8xf32>
    %174 = vector.multi_reduction <maximumf>, %173, %cst_52 [1] : vector<8x32xf32> to vector<8xf32>
    %175 = vector.shape_cast %174 : vector<8xf32> to vector<8x1xf32>
    %176 = vector.broadcast %175 : vector<8x1xf32> to vector<8x32xf32>
    %177 = vector.broadcast %167 : vector<1x32xf32> to vector<8x32xf32>
    %178 = arith.mulf %176, %177 : vector<8x32xf32>
    %179 = arith.addf %166, %178 : vector<8x32xf32>
    %180 = vector.extract_strided_slice %2 {offsets = [24, 0], sizes = [1, 32], strides = [1, 1]} : vector<32x32xf32> to vector<1x32xf32>
    %cst_53 = arith.constant 0.000000e+00 : f32
    %181 = vector.broadcast %cst_53 : f32 to vector<1x32xf32>
    %182 = arith.cmpf ogt, %180, %181 : vector<1x32xf32>
    %cst_54 = arith.constant -1.000000e+30 : f32
    %183 = vector.shape_cast %182 : vector<1x32xi1> to vector<1x32xi1>
    %184 = vector.broadcast %183 : vector<1x32xi1> to vector<8x32xi1>
    %185 = vector.broadcast %cst_54 : f32 to vector<8x32xf32>
    %186 = arith.select %184, %139, %185 : vector<8x32xi1>, vector<8x32xf32>
    %cst_55 = arith.constant dense<0xFF800000> : vector<8xf32>
    %187 = vector.multi_reduction <maximumf>, %186, %cst_55 [1] : vector<8x32xf32> to vector<8xf32>
    %188 = vector.shape_cast %187 : vector<8xf32> to vector<8x1xf32>
    %189 = vector.broadcast %188 : vector<8x1xf32> to vector<8x32xf32>
    %190 = vector.broadcast %180 : vector<1x32xf32> to vector<8x32xf32>
    %191 = arith.mulf %189, %190 : vector<8x32xf32>
    %192 = arith.addf %179, %191 : vector<8x32xf32>
    %193 = arith.subf %139, %192 : vector<8x32xf32>
    %194 = math.exp %193 : vector<8x32xf32>
    %cst_56 = arith.constant dense<0.000000e+00> : vector<8x32xf32>
    %195 = tpu.matmul %194, %2, %cst_56 {dimension_numbers = #tpu.dot_dimension_numbers<[1], [0], [0], [1], [0, 0, 1, 1], [], []>} : vector<8x32xf32>, vector<32x32xf32>, vector<8x32xf32> -> vector<8x32xf32>
    %196 = tpu.reciprocal %195 {approx = true} : vector<8x32xf32> -> vector<8x32xf32>
    %197 = arith.mulf %194, %196 : vector<8x32xf32>
    %cst_57 = arith.constant dense<0.000000e+00> : vector<8x32xf32>
    %198 = tpu.matmul %197, %136, %cst_57 {dimension_numbers = #tpu.dot_dimension_numbers<[1], [0], [0], [1], [0, 0, 1, 1], [], []>} : vector<8x32xf32>, vector<32x32xf32>, vector<8x32xf32> -> vector<8x32xf32>
    %199 = vector.extract_strided_slice %127 {offsets = [8, 0], sizes = [8, 32], strides = [1, 1]} : vector<16x32xf32> to vector<8x32xf32>
    %200 = vector.extract_strided_slice %128 {offsets = [8, 0], sizes = [8, 32], strides = [1, 1]} : vector<16x32xf32> to vector<8x32xf32>
    %201 = vector.extract_strided_slice %129 {offsets = [8, 0], sizes = [8, 32], strides = [1, 1]} : vector<16x32xf32> to vector<8x32xf32>
    %202 = tpu.concatenate %200, %200, %200, %200 in 0 : vector<8x32xf32>, vector<8x32xf32>, vector<8x32xf32>, vector<8x32xf32> -> vector<32x32xf32>
    %203 = arith.mulf %202, %3 : vector<32x32xf32>
    %204 = tpu.concatenate %201, %201, %201, %201 in 0 : vector<8x32xf32>, vector<8x32xf32>, vector<8x32xf32>, vector<8x32xf32> -> vector<32x32xf32>
    %205 = arith.mulf %204, %3 : vector<32x32xf32>
    %cst_58 = arith.constant dense<0.000000e+00> : vector<8x32xf32>
    %206 = tpu.matmul %199, %203, %cst_58 {dimension_numbers = #tpu.dot_dimension_numbers<[1], [1], [0], [0], [0, 0, 1, 0], [], []>} : vector<8x32xf32>, vector<32x32xf32>, vector<8x32xf32> -> vector<8x32xf32>
    %cst_59 = arith.constant 0.353553385 : f32
    %207 = vector.broadcast %cst_59 : f32 to vector<8x32xf32>
    %208 = arith.mulf %206, %207 : vector<8x32xf32>
    %cst_60 = arith.constant 0.000000e+00 : f32
    %209 = vector.broadcast %cst_60 : f32 to vector<8x32xf32>
    %210 = vector.extract_strided_slice %2 {offsets = [0, 0], sizes = [1, 32], strides = [1, 1]} : vector<32x32xf32> to vector<1x32xf32>
    %cst_61 = arith.constant 0.000000e+00 : f32
    %211 = vector.broadcast %cst_61 : f32 to vector<1x32xf32>
    %212 = arith.cmpf ogt, %210, %211 : vector<1x32xf32>
    %cst_62 = arith.constant -1.000000e+30 : f32
    %213 = vector.shape_cast %212 : vector<1x32xi1> to vector<1x32xi1>
    %214 = vector.broadcast %213 : vector<1x32xi1> to vector<8x32xi1>
    %215 = vector.broadcast %cst_62 : f32 to vector<8x32xf32>
    %216 = arith.select %214, %208, %215 : vector<8x32xi1>, vector<8x32xf32>
    %cst_63 = arith.constant dense<0xFF800000> : vector<8xf32>
    %217 = vector.multi_reduction <maximumf>, %216, %cst_63 [1] : vector<8x32xf32> to vector<8xf32>
    %218 = vector.shape_cast %217 : vector<8xf32> to vector<8x1xf32>
    %219 = vector.broadcast %218 : vector<8x1xf32> to vector<8x32xf32>
    %220 = vector.broadcast %210 : vector<1x32xf32> to vector<8x32xf32>
    %221 = arith.mulf %219, %220 : vector<8x32xf32>
    %222 = arith.addf %209, %221 : vector<8x32xf32>
    %223 = vector.extract_strided_slice %2 {offsets = [8, 0], sizes = [1, 32], strides = [1, 1]} : vector<32x32xf32> to vector<1x32xf32>
    %cst_64 = arith.constant 0.000000e+00 : f32
    %224 = vector.broadcast %cst_64 : f32 to vector<1x32xf32>
    %225 = arith.cmpf ogt, %223, %224 : vector<1x32xf32>
    %cst_65 = arith.constant -1.000000e+30 : f32
    %226 = vector.shape_cast %225 : vector<1x32xi1> to vector<1x32xi1>
    %227 = vector.broadcast %226 : vector<1x32xi1> to vector<8x32xi1>
    %228 = vector.broadcast %cst_65 : f32 to vector<8x32xf32>
    %229 = arith.select %227, %208, %228 : vector<8x32xi1>, vector<8x32xf32>
    %cst_66 = arith.constant dense<0xFF800000> : vector<8xf32>
    %230 = vector.multi_reduction <maximumf>, %229, %cst_66 [1] : vector<8x32xf32> to vector<8xf32>
    %231 = vector.shape_cast %230 : vector<8xf32> to vector<8x1xf32>
    %232 = vector.broadcast %231 : vector<8x1xf32> to vector<8x32xf32>
    %233 = vector.broadcast %223 : vector<1x32xf32> to vector<8x32xf32>
    %234 = arith.mulf %232, %233 : vector<8x32xf32>
    %235 = arith.addf %222, %234 : vector<8x32xf32>
    %236 = vector.extract_strided_slice %2 {offsets = [16, 0], sizes = [1, 32], strides = [1, 1]} : vector<32x32xf32> to vector<1x32xf32>
    %cst_67 = arith.constant 0.000000e+00 : f32
    %237 = vector.broadcast %cst_67 : f32 to vector<1x32xf32>
    %238 = arith.cmpf ogt, %236, %237 : vector<1x32xf32>
    %cst_68 = arith.constant -1.000000e+30 : f32
    %239 = vector.shape_cast %238 : vector<1x32xi1> to vector<1x32xi1>
    %240 = vector.broadcast %239 : vector<1x32xi1> to vector<8x32xi1>
    %241 = vector.broadcast %cst_68 : f32 to vector<8x32xf32>
    %242 = arith.select %240, %208, %241 : vector<8x32xi1>, vector<8x32xf32>
    %cst_69 = arith.constant dense<0xFF800000> : vector<8xf32>
    %243 = vector.multi_reduction <maximumf>, %242, %cst_69 [1] : vector<8x32xf32> to vector<8xf32>
    %244 = vector.shape_cast %243 : vector<8xf32> to vector<8x1xf32>
    %245 = vector.broadcast %244 : vector<8x1xf32> to vector<8x32xf32>
    %246 = vector.broadcast %236 : vector<1x32xf32> to vector<8x32xf32>
    %247 = arith.mulf %245, %246 : vector<8x32xf32>
    %248 = arith.addf %235, %247 : vector<8x32xf32>
    %249 = vector.extract_strided_slice %2 {offsets = [24, 0], sizes = [1, 32], strides = [1, 1]} : vector<32x32xf32> to vector<1x32xf32>
    %cst_70 = arith.constant 0.000000e+00 : f32
    %250 = vector.broadcast %cst_70 : f32 to vector<1x32xf32>
    %251 = arith.cmpf ogt, %249, %250 : vector<1x32xf32>
    %cst_71 = arith.constant -1.000000e+30 : f32
    %252 = vector.shape_cast %251 : vector<1x32xi1> to vector<1x32xi1>
    %253 = vector.broadcast %252 : vector<1x32xi1> to vector<8x32xi1>
    %254 = vector.broadcast %cst_71 : f32 to vector<8x32xf32>
    %255 = arith.select %253, %208, %254 : vector<8x32xi1>, vector<8x32xf32>
    %cst_72 = arith.constant dense<0xFF800000> : vector<8xf32>
    %256 = vector.multi_reduction <maximumf>, %255, %cst_72 [1] : vector<8x32xf32> to vector<8xf32>
    %257 = vector.shape_cast %256 : vector<8xf32> to vector<8x1xf32>
    %258 = vector.broadcast %257 : vector<8x1xf32> to vector<8x32xf32>
    %259 = vector.broadcast %249 : vector<1x32xf32> to vector<8x32xf32>
    %260 = arith.mulf %258, %259 : vector<8x32xf32>
    %261 = arith.addf %248, %260 : vector<8x32xf32>
    %262 = arith.subf %208, %261 : vector<8x32xf32>
    %263 = math.exp %262 : vector<8x32xf32>
    %cst_73 = arith.constant dense<0.000000e+00> : vector<8x32xf32>
    %264 = tpu.matmul %263, %2, %cst_73 {dimension_numbers = #tpu.dot_dimension_numbers<[1], [0], [0], [1], [0, 0, 1, 1], [], []>} : vector<8x32xf32>, vector<32x32xf32>, vector<8x32xf32> -> vector<8x32xf32>
    %265 = tpu.reciprocal %264 {approx = true} : vector<8x32xf32> -> vector<8x32xf32>
    %266 = arith.mulf %263, %265 : vector<8x32xf32>
    %cst_74 = arith.constant dense<0.000000e+00> : vector<8x32xf32>
    %267 = tpu.matmul %266, %205, %cst_74 {dimension_numbers = #tpu.dot_dimension_numbers<[1], [0], [0], [1], [0, 0, 1, 1], [], []>} : vector<8x32xf32>, vector<32x32xf32>, vector<8x32xf32> -> vector<8x32xf32>
    %268 = tpu.concatenate %198, %267 in 0 : vector<8x32xf32>, vector<8x32xf32> -> vector<16x32xf32>
    %c0_75 = arith.constant 0 : index
    %c0_76 = arith.constant 0 : index
    %269 = vector.load %arg4[%c0_75, %c0_76] : memref<32x32xf32, #tpu.memory_space<vmem>>, vector<32x32xf32>
    %cst_77 = arith.constant dense<0.000000e+00> : vector<16x32xf32>
    %270 = tpu.matmul %268, %269, %cst_77 {dimension_numbers = #tpu.dot_dimension_numbers<[1], [0], [0], [1], [0, 0, 1, 1], [], []>} : vector<16x32xf32>, vector<32x32xf32>, vector<16x32xf32> -> vector<16x32xf32>
    %271 = vector.broadcast %12 : vector<1x32xf32> to vector<16x32xf32>
    %272 = arith.addf %270, %271 : vector<16x32xf32>
    %273 = vector.broadcast %9 : vector<1x32xf32> to vector<16x32xf32>
    %274 = arith.mulf %122, %273 : vector<16x32xf32>
    %275 = arith.addf %274, %272 : vector<16x32xf32>
    %cst_78 = arith.constant dense<0.000000e+00> : vector<16xf32>
    %276 = vector.multi_reduction <add>, %275, %cst_78 [1] : vector<16x32xf32> to vector<16xf32>
    %277 = vector.shape_cast %276 : vector<16xf32> to vector<16x1xf32>
    %cst_79 = arith.constant 3.200000e+01 : f32
    %278 = vector.broadcast %cst_79 : f32 to vector<16x1xf32>
    %279 = arith.divf %277, %278 : vector<16x1xf32>
    %280 = vector.broadcast %279 : vector<16x1xf32> to vector<16x32xf32>
    %281 = arith.subf %275, %280 : vector<16x32xf32>
    %282 = arith.mulf %281, %281 : vector<16x32xf32>
    %cst_80 = arith.constant dense<0.000000e+00> : vector<16xf32>
    %283 = vector.multi_reduction <add>, %282, %cst_80 [1] : vector<16x32xf32> to vector<16xf32>
    %284 = vector.shape_cast %283 : vector<16xf32> to vector<16x1xf32>
    %cst_81 = arith.constant 3.200000e+01 : f32
    %285 = vector.broadcast %cst_81 : f32 to vector<16x1xf32>
    %286 = arith.divf %284, %285 : vector<16x1xf32>
    %287 = vector.broadcast %279 : vector<16x1xf32> to vector<16x32xf32>
    %288 = arith.subf %275, %287 : vector<16x32xf32>
    %cst_82 = arith.constant 9.99999974E-6 : f32
    %289 = vector.broadcast %cst_82 : f32 to vector<16x1xf32>
    %290 = arith.addf %286, %289 : vector<16x1xf32>
    %291 = math.rsqrt %290 : vector<16x1xf32>
    %292 = vector.broadcast %291 : vector<16x1xf32> to vector<16x32xf32>
    %293 = arith.mulf %288, %292 : vector<16x32xf32>
    %294 = vector.broadcast %10 : vector<1x32xf32> to vector<16x32xf32>
    %295 = arith.mulf %293, %294 : vector<16x32xf32>
    %296 = vector.broadcast %11 : vector<1x32xf32> to vector<16x32xf32>
    %297 = arith.addf %295, %296 : vector<16x32xf32>
    %298 = vector.extract_strided_slice %297 {offsets = [0, 0], sizes = [8, 32], strides = [1, 1]} : vector<16x32xf32> to vector<8x32xf32>
    %299 = tpu.concatenate %298, %298, %298, %298 in 0 : vector<8x32xf32>, vector<8x32xf32>, vector<8x32xf32>, vector<8x32xf32> -> vector<32x32xf32>
    %300 = arith.mulf %299, %3 : vector<32x32xf32>
    %301 = vector.extract_strided_slice %77 {offsets = [0, 0], sizes = [16, 32], strides = [1, 1]} : vector<32x32xf32> to vector<16x32xf32>
    %cst_83 = arith.constant dense<0.000000e+00> : vector<16x32xf32>
    %302 = tpu.matmul %301, %300, %cst_83 {dimension_numbers = #tpu.dot_dimension_numbers<[1], [0], [0], [1], [0, 0, 1, 1], [], []>} : vector<16x32xf32>, vector<32x32xf32>, vector<16x32xf32> -> vector<16x32xf32>
    %303 = vector.extract_strided_slice %297 {offsets = [8, 0], sizes = [8, 32], strides = [1, 1]} : vector<16x32xf32> to vector<8x32xf32>
    %304 = tpu.concatenate %303, %303, %303, %303 in 0 : vector<8x32xf32>, vector<8x32xf32>, vector<8x32xf32>, vector<8x32xf32> -> vector<32x32xf32>
    %305 = arith.mulf %304, %3 : vector<32x32xf32>
    %306 = vector.extract_strided_slice %77 {offsets = [16, 0], sizes = [16, 32], strides = [1, 1]} : vector<32x32xf32> to vector<16x32xf32>
    %cst_84 = arith.constant dense<0.000000e+00> : vector<16x32xf32>
    %307 = tpu.matmul %306, %305, %cst_84 {dimension_numbers = #tpu.dot_dimension_numbers<[1], [0], [0], [1], [0, 0, 1, 1], [], []>} : vector<16x32xf32>, vector<32x32xf32>, vector<16x32xf32> -> vector<16x32xf32>
    %308 = tpu.concatenate %302, %307 in 0 : vector<16x32xf32>, vector<16x32xf32> -> vector<32x32xf32>
    %c0_85 = arith.constant 0 : index
    %c0_86 = arith.constant 0 : index
    %309 = vector.load %arg5[%c0_85, %c0_86] : memref<32x128xf32, #tpu.memory_space<vmem>>, vector<32x128xf32>
    %cst_87 = arith.constant dense<0.000000e+00> : vector<32x128xf32>
    %310 = tpu.matmul %308, %309, %cst_87 {dimension_numbers = #tpu.dot_dimension_numbers<[1], [0], [0], [1], [0, 0, 1, 1], [], []>} : vector<32x32xf32>, vector<32x128xf32>, vector<32x128xf32> -> vector<32x128xf32>
    %311 = vector.broadcast %13 : vector<1x128xf32> to vector<32x128xf32>
    %312 = arith.addf %310, %311 : vector<32x128xf32>
    %c0_88 = arith.constant 0 : index
    %c0_89 = arith.constant 0 : index
    %313 = vector.load %arg10[%c0_88, %c0_89] : memref<32x128xf32, #tpu.memory_space<vmem>>, vector<32x128xf32>
    tpu.vector_store %arg10[%c0_88, %c0_89], %312 {strides = array<i32>} : memref<32x128xf32, #tpu.memory_space<vmem>>, vector<32x128xf32>,
    return
  }
  func.func @transform_0(%arg0: i32) -> (i32, i32) {
    %c0_i32 = arith.constant 0 : i32
    %c0_i32_0 = arith.constant 0 : i32
    return %arg0, %c0_i32 : i32, i32
  }
  func.func @transform_1(%arg0: i32) -> (i32, i32) {
    %c0_i32 = arith.constant 0 : i32
    %c0_i32_0 = arith.constant 0 : i32
    %c0_i32_1 = arith.constant 0 : i32
    return %c0_i32, %c0_i32_0 : i32, i32
  }
  func.func @transform_2(%arg0: i32) -> (i32, i32) {
    %c0_i32 = arith.constant 0 : i32
    %c0_i32_0 = arith.constant 0 : i32
    %c0_i32_1 = arith.constant 0 : i32
    return %c0_i32, %c0_i32_0 : i32, i32
  }
  func.func @transform_3(%arg0: i32) -> (i32, i32) {
    %c0_i32 = arith.constant 0 : i32
    %c0_i32_0 = arith.constant 0 : i32
    %c0_i32_1 = arith.constant 0 : i32
    return %c0_i32, %c0_i32_0 : i32, i32
  }
  func.func @transform_4(%arg0: i32) -> (i32, i32) {
    %c0_i32 = arith.constant 0 : i32
    %c0_i32_0 = arith.constant 0 : i32
    %c0_i32_1 = arith.constant 0 : i32
    return %c0_i32, %c0_i32_0 : i32, i32
  }
  func.func @transform_5(%arg0: i32) -> (i32, i32) {
    %c0_i32 = arith.constant 0 : i32
    %c0_i32_0 = arith.constant 0 : i32
    %c0_i32_1 = arith.constant 0 : i32
    return %c0_i32, %c0_i32_0 : i32, i32
  }
  func.func @transform_6(%arg0: i32) -> (i32, i32) {
    %c0_i32 = arith.constant 0 : i32
    %c0_i32_0 = arith.constant 0 : i32
    %c0_i32_1 = arith.constant 0 : i32
    return %c0_i32, %c0_i32_0 : i32, i32
  }
  func.func @transform_7(%arg0: i32) -> (i32, i32) {
    %c0_i32 = arith.constant 0 : i32
    %c0_i32_0 = arith.constant 0 : i32
    %c0_i32_1 = arith.constant 0 : i32
    return %c0_i32, %c0_i32_0 : i32, i32
  }
  func.func @transform_8(%arg0: i32) -> (i32, i32) {
    %c0_i32 = arith.constant 0 : i32
    %c0_i32_0 = arith.constant 0 : i32
    %c0_i32_1 = arith.constant 0 : i32
    return %c0_i32, %c0_i32_0 : i32, i32
  }
  func.func @transform_9(%arg0: i32) -> (i32, i32) {
    %c0_i32 = arith.constant 0 : i32
    %c0_i32_0 = arith.constant 0 : i32
    return %arg0, %c0_i32 : i32, i32
  }
}

</mosaic_0001>

<bundles_post_ra>
// kernel: tpu_custom_call.1
= control target key start
LH: loop header
LB: loop body
LE: loop exit
PB: predicated region body
PF: predicated region fallthrough
CT: control target
= control target key end

     0   :  { %14 = vsyncpa [#allocation3], 0  ;;  %s3286_s0 = inlined_call_operand.hbm [shape: f32[32,32], index: 0, kind: input, shape index: {}]   ;;  %s3287_s1 = inlined_call_operand.hbm [shape: f32[32,64], index: 1, kind: input, shape index: {}]   ;;  %s3288_s2 = inlined_call_operand.hbm [shape: f32[32,96], index: 2, kind: input, shape index: {}]   ;;  %s3289_s3 = inlined_call_operand.hbm [shape: f32[32,32], index: 3, kind: input, shape index: {}]   ;;  %s3290_s4 = inlined_call_operand.hbm [shape: f32[32,128], index: 4, kind: input, shape index: {}]   ;;  %s3291_s5 = inlined_call_operand.hbm [shape: f32[9,128], index: 5, kind: input, shape index: {}]   ;;  %s3292_s6 = inlined_call_operand.hbm [shape: f32[32,32], index: 6, kind: input, shape index: {}]   ;;  %s3293_s7 = inlined_call_operand.hbm [shape: f32[32,32], index: 7, kind: input, shape index: {}]   ;;  %s3294_s8 = inlined_call_operand.vmem [shape: f32[8,32], index: 8, kind: input, shape index: {}]   ;;  %s3295_s9 = inlined_call_operand.hbm [shape: f32[32,128], index: 9, kind: output, shape index: {}]  }
   0x1   :  { %15 = vsyncpa [#allocation6], 0 }
   0x2   :  { %16 = vsyncpa [#allocation9], 0 }
   0x3   :  { %17 = vsyncpa [#allocation12], 0 }
   0x4   :  { %18 = vsyncpa [#allocation15], 0 }
   0x5   :  { %19 = vsyncpa [#allocation4], 0  ;;  %s2734_s30 = smov [#allocation5]   ;;  %s2735_s11 = smov [#allocation8]  }
   0x6   :  { %s37_s10 = sshll.u32 %s2734_s30, 4  ;;  %s61_s12 = sshll.u32 %s2735_s11, 4  ;;  %s38_s10 = int_to_ptr.vmem [resolvable:$true] %s37_s10  ;;  %s62_s12 = int_to_ptr.vmem [resolvable:$true] %s61_s12 }
   0x7   :  { %s2550_s13 = scalar_lea.vmem %s38_s10, 512  ;;  %p2555_p1 = scmp.lt.s32.totalorder %s38_s10, %s38_s10 }
   0x8   :  { %p2551_p0 = scmp.ne.s32.totalorder %s38_s10, %s2550_s13  ;;  %p2556_p2 = scmp.lt.s32.totalorder %s2550_s13, %s2550_s13 }
   0xa   :  { %p2557_p3 = por %p2556_p2, %p2555_p1 }
   0xc   :  { %p2558_p4 = pnand %p2557_p3, %p2551_p0 }
   0xe   :  { %2561 = shalt.err (!%p2558_p4)
}
   0xf   :  { %s2736_s14 = smov 128   ;;  %s2737_s15 = smov 8  }
  0x10   :  { %43 = dma.hbm_to_vmem [thread:$0]  %s3287_s1, 512, %s38_s10, [#allocation6], %s2736_s14, %s2736_s14, %s2737_s15  }
  0x11   :  { %s2570_s18 = scalar_lea.vmem %s62_s12, 512  ;;  %p2575_p6 = scmp.lt.s32.totalorder %s62_s12, %s62_s12 }
  0x12   :  { %p2571_p5 = scmp.ne.s32.totalorder %s62_s12, %s2570_s18  ;;  %p2576_p7 = scmp.lt.s32.totalorder %s2570_s18, %s2570_s18 }
  0x14   :  { %p2577_p8 = por %p2576_p7, %p2575_p6 }
  0x16   :  { %p2578_p9 = pnand %p2577_p8, %p2571_p5 }
  0x18   :  { %2581 = shalt.err (!%p2578_p9)
}
  0x19   :  { %67 = dma.hbm_to_vmem [thread:$0]  %s3289_s3, 512, %s62_s12, [#allocation9], %s2736_s14, %s2736_s14, %s2737_s15  }
  0x1a   :  { %s2738_s21 = smov [#allocation11]   ;;  %s2739_s23 = smov [#allocation2]  }
  0x1b   :  { %s85_s22 = sshll.u32 %s2738_s21, 4  ;;  %s25_s24 = sshll.u32 %s2739_s23, 4  ;;  %s86_s22 = int_to_ptr.vmem [resolvable:$true] %s85_s22  ;;  %s26_s24 = int_to_ptr.vmem [resolvable:$true] %s25_s24 }
  0x1c   :  { %s2590_s1 = scalar_lea.vmem %s86_s22, 256  ;;  %p2595_p11 = scmp.lt.s32.totalorder %s86_s22, %s86_s22 }
  0x1d   :  { %p2591_p10 = scmp.ne.s32.totalorder %s86_s22, %s2590_s1  ;;  %p2596_p12 = scmp.lt.s32.totalorder %s2590_s1, %s2590_s1 }
  0x1f   :  { %p2597_p13 = por %p2596_p12, %p2595_p11 }
  0x21   :  { %p2598_p0 = pnand %p2597_p13, %p2591_p10 }
  0x23   :  { %2601 = shalt.err (!%p2598_p0)
}
  0x24   :  { %91 = dma.hbm_to_vmem [thread:$0]  %s3291_s5, 256, %s86_s22, [#allocation12], %s2736_s14, %s2736_s14, %s2737_s15  }
  0x25   :  { %s2610_s3 = scalar_lea.vmem %s26_s24, 512  ;;  %p2615_p2 = scmp.lt.s32.totalorder %s26_s24, %s26_s24 }
  0x26   :  { %p2611_p1 = scmp.ne.s32.totalorder %s26_s24, %s2610_s3  ;;  %p2616_p3 = scmp.lt.s32.totalorder %s2610_s3, %s2610_s3 }
  0x28   :  { %p2617_p4 = por %p2616_p3, %p2615_p2 }
  0x2a   :  { %p2618_p5 = pnand %p2617_p4, %p2611_p1 }
  0x2c   :  { %2621 = shalt.err (!%p2618_p5)
}
  0x2d   :  { %31 = dma.hbm_to_vmem [thread:$0]  %s3286_s0, 512, %s26_s24, [#allocation3], %s2736_s14, %s2736_s14, %s2737_s15  }
  0x2e   :  { %s2740_s29 = smov [#allocation7]   ;;  %s2741_s10 = smov [#allocation10]  }
  0x2f   :  { %s49_s30 = sshll.u32 %s2740_s29, 4  ;;  %s73_s11 = sshll.u32 %s2741_s10, 4  ;;  %s50_s30 = int_to_ptr.vmem [resolvable:$true] %s49_s30  ;;  %s74_s11 = int_to_ptr.vmem [resolvable:$true] %s73_s11 }
  0x30   :  { %s2630_s5 = scalar_lea.vmem %s50_s30, 512  ;;  %p2635_p7 = scmp.lt.s32.totalorder %s50_s30, %s50_s30 }
  0x31   :  { %p2631_p6 = scmp.ne.s32.totalorder %s50_s30, %s2630_s5  ;;  %p2636_p8 = scmp.lt.s32.totalorder %s2630_s5, %s2630_s5 }
  0x33   :  { %p2637_p9 = por %p2636_p8, %p2635_p7 }
  0x35   :  { %p2638_p10 = pnand %p2637_p9, %p2631_p6 }
  0x37   :  { %2641 = shalt.err (!%p2638_p10)
}
  0x38   :  { %55 = dma.hbm_to_vmem [thread:$0]  %s3288_s2, 512, %s50_s30, [#allocation6], %s2736_s14, %s2736_s14, %s2737_s15  }
  0x39   :  { %s2650_s0 = scalar_lea.vmem %s74_s11, 512  ;;  %p2655_p12 = scmp.lt.s32.totalorder %s74_s11, %s74_s11 }
  0x3a   :  { %p2651_p11 = scmp.ne.s32.totalorder %s74_s11, %s2650_s0  ;;  %p2656_p13 = scmp.lt.s32.totalorder %s2650_s0, %s2650_s0 }
  0x3c   :  { %p2657_p0 = por %p2656_p13, %p2655_p12 }
  0x3e   :  { %p2658_p1 = pnand %p2657_p0, %p2651_p11 }
  0x40   :  { %2661 = shalt.err (!%p2658_p1)
}
  0x41   :  { %79 = dma.hbm_to_vmem [thread:$0]  %s3290_s4, 512, %s74_s11, [#allocation9], %s2736_s14, %s2736_s14, %s2737_s15  }
  0x42   :  { %s2742_s18 = smov [#allocation13]   ;;  %s2743_s20 = smov [#allocation14]  }
  0x43   :  { %s97_s19 = sshll.u32 %s2742_s18, 4  ;;  %s109_s21 = sshll.u32 %s2743_s20, 4  ;;  %s98_s19 = int_to_ptr.vmem [resolvable:$true] %s97_s19  ;;  %s110_s21 = int_to_ptr.vmem [resolvable:$true] %s109_s21 }
  0x44   :  { %s2670_s2 = scalar_lea.vmem %s98_s19, 512  ;;  %p2675_p3 = scmp.lt.s32.totalorder %s98_s19, %s98_s19 }
  0x45   :  { %p2671_p2 = scmp.ne.s32.totalorder %s98_s19, %s2670_s2  ;;  %p2676_p4 = scmp.lt.s32.totalorder %s2670_s2, %s2670_s2 }
  0x47   :  { %p2677_p5 = por %p2676_p4, %p2675_p3 }
  0x49   :  { %p2678_p6 = pnand %p2677_p5, %p2671_p2 }
  0x4b   :  { %2681 = shalt.err (!%p2678_p6)
}
  0x4c   :  { %103 = dma.hbm_to_vmem [thread:$0]  %s3292_s6, 512, %s98_s19, [#allocation12], %s2736_s14, %s2736_s14, %s2737_s15  }
  0x4d   :  { %s2690_s4 = scalar_lea.vmem %s110_s21, 512  ;;  %p2695_p8 = scmp.lt.s32.totalorder %s110_s21, %s110_s21 }
  0x4e   :  { %p2691_p7 = scmp.ne.s32.totalorder %s110_s21, %s2690_s4  ;;  %p2696_p9 = scmp.lt.s32.totalorder %s2690_s4, %s2690_s4 }
  0x50   :  { %p2697_p10 = por %p2696_p9, %p2695_p8 }
  0x52   :  { %p2698_p11 = pnand %p2697_p10, %p2691_p7 }
  0x54   :  { %2701 = shalt.err (!%p2698_p11)
}
  0x55   :  { %115 = dma.hbm_to_vmem [thread:$0]  %s3293_s7, 512, %s110_s21, [#allocation15], %s2736_s14, %s2736_s14, %s2737_s15  }
  0x56   :  { %2722 = dma.done.wait [#allocation3], 512  }
  0x57   :  { %2723 = vsyncadd [#allocation3], 4294966784 }
  0x58   :  { %2724 = dma.done.wait [#allocation6], 1024  }
  0x59   :  { %2725 = vsyncadd [#allocation6], 4294966272 }
  0x5a   :  { %2726 = dma.done.wait [#allocation9], 1024  }
  0x5b   :  { %2727 = vsyncadd [#allocation9], 4294966272 }
  0x5c   :  { %2728 = dma.done.wait [#allocation12], 768  }
  0x5d   :  { %2729 = vsyncadd [#allocation12], 4294966528 }
  0x5e   :  { %2730 = dma.done.wait [#allocation15], 512  }
  0x5f   :  { %2731 = vsyncadd [#allocation15], 4294966784  ;;  %vm165_vm0 = vcmask 261120   ;;  %v160_v0 = vld [vmem:[#allocation5 + $0x18] sm:$0xff]  ;;  %v159_v1 = vld [vmem:[#allocation5 + $0x10] sm:$0xff]  ;;  %v161_v12 = vlaneseq  ;;  %v2744_v15 = vmov 0  }
  0x60   :  { %2294 = vmatprep.subr.mxu0 %v160_v0  ;;  %v142_v2 = vld [vmem:[#allocation2] sm:$0xff]  ;;  %v158_v3 = vld [vmem:[#allocation5 + $0x8] sm:$0xff]  ;;  %v144_v6 = vld [vmem:[#allocation2 + $0x10] sm:$0xff]  ;;  %s2745_s6 = smov 96   ;;  %vm573_vm9 = vcmask 130048   ;;  %vm2747_vm10 = vmmov 0  }
  0x61   :  { %2295 = vmatpush3.msra.mxu0 %v160_v0  ;;  %2302 = vmatprep.mubr.msk.f32.mxu0 %vm165_vm0, %v142_v2  ;;  %v157_v4 = vld [vmem:[#allocation5] sm:$0xff]  ;;  %v143_v5 = vld [vmem:[#allocation2 + $0x8] sm:$0xff]  ;;  %v145_v7 = vld [vmem:[#allocation2 + $0x18] sm:$0xff]  ;;  %v2869_v13 = vshrl.u32 %v161_v12, 7  ;;  %s2749_s26 = smov 64   ;;  %s2750_s3 = smov [#allocation16]  }
  0x62   :  { %2296 = vmatprep.subr.mxu0 %v159_v1  ;;  %v2853_v8 = vld [vmem:[#allocation13 + $0x18] sm:$0xff]  ;;  %v2856_v9 = vld [vmem:[#allocation13 + $0x10] sm:$0xff]  ;;  %v2860_v10 = vld [vmem:[#allocation13 + $0x8] sm:$0xff]  ;;  %s2133_s27 = sshll.u32 %s2750_s3, 4  ;;  %s2134_s27 = int_to_ptr.vmem [resolvable:$true] %s2133_s27 }
  0x63   :  { %2297 = vmatpush3.msra.mxu0 %v159_v1  ;;  %2308 = vmatprep.subr.mxu1 %v2853_v8  ;;  %v2864_v11 = vld [vmem:[#allocation13] sm:$0xff]  ;;  %v2873_v14 = vsub.s32 0, %v2869_v13  ;;  %vm298_vm2 = vcmp.gt.f32.partialorder %v2860_v10, 0.0  ;;  %v2876_v17 = vld [vmem:[#allocation11] sm:$0xff]  ;;  %vm333_vm3 = vcmp.gt.f32.partialorder %v2856_v9, 0.0  ;;  %vm368_vm5 = vcmp.gt.f32.partialorder %v2853_v8, 0.0  ;;  %p2707_p13 = scmp.lt.s32.totalorder %s2134_s27, %s2134_s27 }
  0x64   :  { %2298 = vmatprep.subr.mxu0 %v158_v3  ;;  %2309 = vmatpush3.msra.mxu1 %v2853_v8  ;;  %vm263_vm1 = vcmp.gt.f32.partialorder %v2864_v11, 0.0  ;;  %v299_v18 = vsel %vm298_vm2, 1, %v2744_v15  ;;  %v334_v22 = vsel %vm333_vm3, 1, %v2744_v15  ;;  %v369_v31 = vsel %vm368_vm5, 1, %v2744_v15  ;;  %s2702_s28 = scalar_lea.vmem %s2134_s27, 512 }
  0x65   :  { %2299 = vmatpush3.msra.mxu0 %v158_v3  ;;  %2310 = vmatprep.subr.mxu1 %v2856_v9  ;;  %v264_v16 = vsel %vm263_vm1, 1, %v2744_v15  ;;  %v164_v20 = vrot.slane %v2876_v17, %v2873_v14  ;;  %v303_v21 = vrot.slane %v299_v18, %v2873_v14  ;;  %v338_v28 = vrot.slane %v334_v22, %v2873_v14  ;;  %p2703_p12 = scmp.ne.s32.totalorder %s2134_s27, %s2702_s28  ;;  %p2708_p0 = scmp.lt.s32.totalorder %s2702_s28, %s2702_s28 }
  0x66   :  { %2300 = vmatprep.subr.mxu0 %v157_v4  ;;  %2311 = vmatpush3.msra.mxu1 %v2856_v9  ;;  %v268_v19 = vrot.slane %v264_v16, %v2873_v14  ;;  %v373_v37 = vrot.slane %v369_v31, %v2873_v14  ;;  %v2984_v12 = vrot.slane %v2860_v10, %v2873_v14 }
  0x67   :  { %2301 = vmatpush3.msra.mxu0 %v157_v4  ;;  %2312 = vmatprep.subr.mxu1 %v2860_v10  ;;  %vm2890_vm6 = vcmp.eq.s32.totalorder %v303_v21, 1  ;;  %vm2908_vm7 = vcmp.eq.s32.totalorder %v338_v28, 1  ;;  %v2988_v16 = vrot.slane %v2864_v11, %v2873_v14  ;;  %v2992_v18 = vrot.slane %v2856_v9, %v2873_v14  ;;  %p2709_p1 = por %p2708_p0, %p2707_p13 }
  0x68   :  { %2303 = vmatmul.mubr.msk.f32.vlgmr.msra.gmra.mxu0 %vm165_vm0, %v143_v5  ;;  %2313 = vmatpush3.msra.mxu1 %v2860_v10  ;;  %vm2883_vm4 = vcmp.eq.s32.totalorder %v268_v19, 1  ;;  %vm2921_vm8 = vcmp.eq.s32.totalorder %v373_v37, 1  ;;  %v3000_v28 = vrot.slane %v2853_v8, %v2873_v14 }
  0x69   :  { %2305 = vmatprep.mubr.msk.f32.mxu0 %vm165_vm0, %v144_v6  ;;  %2314 = vmatprep.subr.mxu1 %v2864_v11  ;;  %p2710_p2 = pnand %p2709_p1, %p2703_p12 }
  0x6a   :  { %2315 = vmatpush3.msra.mxu1 %v2864_v11 }
  0x6c   :  { %2306 = vmatmul.mubr.msk.f32.gmra.mxu0 %vm165_vm0, %v145_v7 }
 0x128   :  { %v2304_v23 = vpop.f32.mrf.mxu0 }
 0x129   :  { %v2888_v25 = vadd.f32 %v2304_v23, %v164_v20 }
 0x12a   :  { %v244_v26 = vpop.f32.mrf.mxu0 }
 0x12b   :  { %v2895_v29 = vadd.f32 %v244_v26, %v164_v20  ;;  %v271_v30 = vsel %vm2883_vm4, %v2888_v25, -1e+30  ;;  %v306_v34 = vsel %vm2890_vm6, %v2888_v25, -1e+30  ;;  %v341_v41 = vsel %vm2908_vm7, %v2888_v25, -1e+30 }
 0x12c   :  { %v277_v32 = vsel %vm165_vm0, %v271_v30, -inf  ;;  %v312_v39 = vsel %vm165_vm0, %v306_v34, -inf  ;;  %v2307_v40 = vpop.f32.mrf.mxu0  ;;  %v347_v46 = vsel %vm165_vm0, %v341_v41, -inf  ;;  %v376_v48 = vsel %vm2921_vm8, %v2888_v25, -1e+30 }
 0x12d   :  { %278 = vmax.xlane.f32.xlu1 %v277_v32  ;;  %v270_v33 = vsel %vm2883_vm4, %v2895_v29, -1e+30  ;;  %v305_v38 = vsel %vm2890_vm6, %v2895_v29, -1e+30  ;;  %v340_v44 = vsel %vm2908_vm7, %v2895_v29, -1e+30  ;;  %v2928_v45 = vadd.f32 %v2307_v40, %v164_v20 }
 0x12e   :  { %v274_v35 = vsel %vm165_vm0, %v270_v33, -inf  ;;  %v309_v42 = vsel %vm165_vm0, %v305_v38, -inf  ;;  %v254_v47 = vpop.f32.mrf.mxu0  ;;  %v344_v49 = vsel %vm165_vm0, %v340_v44, -inf  ;;  %v375_v50 = vsel %vm2921_vm8, %v2895_v29, -1e+30 }
 0x12f   :  { %275 = vmax.xlane.f32.xlu0 %v274_v35  ;;  %v2938_v51 = vadd.f32 %v254_v47, %v164_v20  ;;  %v308_v52 = vsel %vm2890_vm6, %v2928_v45, -1e+30  ;;  %v382_v53 = vsel %vm165_vm0, %v376_v48, -inf  ;;  %v273_v54 = vsel %vm2883_vm4, %v2928_v45, -1e+30 }
 0x130   :  { %v379_v55 = vsel %vm165_vm0, %v375_v50, -inf  ;;  %v318_v56 = vsel %vm165_vm0, %v308_v52, -inf  ;;  %v283_v58 = vsel %vm165_vm0, %v273_v54, -inf  ;;  %v343_v61 = vsel %vm2908_vm7, %v2928_v45, -1e+30 }
 0x131   :  { %313 = vmax.xlane.f32.xlu1 %v312_v39  ;;  %v307_v57 = vsel %vm2890_vm6, %v2938_v51, -1e+30  ;;  %v272_v59 = vsel %vm2883_vm4, %v2938_v51, -1e+30  ;;  %v342_v63 = vsel %vm2908_vm7, %v2938_v51, -1e+30 }
 0x132   :  { %v315_v60 = vsel %vm165_vm0, %v307_v57, -inf  ;;  %v280_v62 = vsel %vm165_vm0, %v272_v59, -inf  ;;  %v353_v0 = vsel %vm165_vm0, %v343_v61, -inf  ;;  %v378_v1 = vsel %vm2921_vm8, %v2928_v45, -1e+30 }
 0x133   :  { %310 = vmax.xlane.f32.xlu0 %v309_v42  ;;  %v350_v2 = vsel %vm165_vm0, %v342_v63, -inf  ;;  %v377_v3 = vsel %vm2921_vm8, %v2938_v51, -1e+30  ;;  %v388_v4 = vsel %vm165_vm0, %v378_v1, -inf }
 0x134   :  { %v385_v5 = vsel %vm165_vm0, %v377_v3, -inf }
 0x135   :  { %348 = vmax.xlane.f32.xlu1 %v347_v46 }
 0x137   :  { %345 = vmax.xlane.f32.xlu0 %v344_v49 }
 0x139   :  { %383 = vmax.xlane.f32.xlu1 %v382_v53 }
 0x13b   :  { %380 = vmax.xlane.f32.xlu0 %v379_v55 }
 0x13d   :  { %319 = vmax.xlane.f32.xlu1 %v318_v56 }
 0x13f   :  { %284 = vmax.xlane.f32.xlu0 %v283_v58 }
 0x141   :  { %316 = vmax.xlane.f32.xlu1 %v315_v60 }
 0x143   :  { %281 = vmax.xlane.f32.xlu0 %v280_v62 }
 0x145   :  { %354 = vmax.xlane.f32.xlu1 %v353_v0 }
 0x147   :  { %351 = vmax.xlane.f32.xlu0 %v350_v2 }
 0x149   :  { %389 = vmax.xlane.f32.xlu1 %v388_v4 }
 0x14b   :  { %386 = vmax.xlane.f32.xlu0 %v385_v5 }
 0x15a   :  { %567 = vrot.lane.b32.xlu1 %v2895_v29, %s2745_s6 }
 0x161   :  { %569 = vrot.lane.b32.xlu0 %v2888_v25, %s2745_s6 }
 0x165   :  { %797 = vrot.lane.b32.xlu0 %v2928_v45, %s2745_s6 }
 0x169   :  { %795 = vrot.lane.b32.xlu0 %v2938_v51, %s2745_s6 }
 0x1b6   :  { %v279_v6 = vpop.xlane.xlu1 %278 }
 0x1b7   :  { %v291_v22 = vmul.f32 %v2988_v16, %v279_v6 }
 0x1b8   :  { %v276_v7 = vpop.xlane.xlu0 %275 }
 0x1b9   :  { %v290_v31 = vmul.f32 %v2988_v16, %v276_v7 }
 0x1ba   :  { %v314_v15 = vpop.xlane.xlu1 %313 }
 0x1bb   :  { %v326_v20 = vmul.f32 %v2984_v12, %v314_v15 }
 0x1bc   :  { %v311_v19 = vpop.xlane.xlu0 %310 }
 0x1bd   :  { %v325_v23 = vmul.f32 %v2984_v12, %v311_v19  ;;  %v330_v32 = vadd.f32 %v326_v20, %v291_v22 }
 0x1be   :  { %v349_v21 = vpop.xlane.xlu1 %348 }
 0x1bf   :  { %v361_v26 = vmul.f32 %v2992_v18, %v349_v21  ;;  %v329_v35 = vadd.f32 %v325_v23, %v290_v31 }
 0x1c0   :  { %v346_v30 = vpop.xlane.xlu0 %345 }
 0x1c1   :  { %v360_v33 = vmul.f32 %v2992_v18, %v346_v30  ;;  %v365_v37 = vadd.f32 %v361_v26, %v330_v32 }
 0x1c2   :  { %v384_v34 = vpop.xlane.xlu1 %383 }
 0x1c3   :  { %v396_v38 = vmul.f32 %v3000_v28, %v384_v34  ;;  %v364_v40 = vadd.f32 %v360_v33, %v329_v35 }
 0x1c4   :  { %v381_v39 = vpop.xlane.xlu0 %380 }
 0x1c5   :  { %v400_v41 = vadd.f32 %v396_v38, %v365_v37  ;;  %v395_v42 = vmul.f32 %v3000_v28, %v381_v39 }
 0x1c6   :  { %v320_v44 = vpop.xlane.xlu1 %319 }
 0x1c7   :  { %v404_v14 = vsub.f32 %v2888_v25, %v400_v41  ;;  %v399_v46 = vadd.f32 %v395_v42, %v364_v40  ;;  %v328_v49 = vmul.f32 %v2984_v12, %v320_v44 }
 0x1c8   :  { %v285_v47 = vpop.xlane.xlu0 %284 }
 0x1c9   :  { %v403_v48 = vsub.f32 %v2895_v29, %v399_v46  ;;  %v293_v50 = vmul.f32 %v2988_v16, %v285_v47  ;;  %v409_v52 = vmul.f32 1.442695, %v404_v14 }
 0x1ca   :  { %v317_v53 = vpop.xlane.xlu1 %316 }
 0x1cb   :  { %v407_v54 = vmul.f32 1.442695, %v403_v48  ;;  %v327_v55 = vmul.f32 %v2984_v12, %v317_v53  ;;  %v332_v57 = vadd.f32 %v328_v49, %v293_v50 }
 0x1cc   :  { %v282_v56 = vpop.xlane.xlu0 %281 }
 0x1cd   :  { %2505 = vpow2.f32 %v407_v54  ;;  %v292_v58 = vmul.f32 %v2988_v16, %v282_v56 }
 0x1ce   :  { %2507 = vpow2.f32 %v409_v52  ;;  %v355_v25 = vpop.xlane.xlu1 %354 }
 0x1cf   :  { %v331_v59 = vadd.f32 %v327_v55, %v292_v58  ;;  %v363_v60 = vmul.f32 %v2992_v18, %v355_v25 }
 0x1d0   :  { %v352_v29 = vpop.xlane.xlu0 %351 }
 0x1d1   :  { %v367_v61 = vadd.f32 %v363_v60, %v332_v57  ;;  %v362_v62 = vmul.f32 %v2992_v18, %v352_v29 }
 0x1d2   :  { %v390_v63 = vpop.xlane.xlu1 %389 }
 0x1d3   :  { %v366_v0 = vadd.f32 %v362_v62, %v331_v59  ;;  %v398_v1 = vmul.f32 %v3000_v28, %v390_v63 }
 0x1d4   :  { %v387_v2 = vpop.xlane.xlu0 %386 }
 0x1d5   :  { %v402_v3 = vadd.f32 %v398_v1, %v367_v61  ;;  %v397_v4 = vmul.f32 %v3000_v28, %v387_v2 }
 0x1d6   :  { %v568_v21 = vpop.permute.xlu1 %567 }
 0x1d7   :  { %v406_v5 = vsub.f32 %v2928_v45, %v402_v3  ;;  %v401_v6 = vadd.f32 %v397_v4, %v366_v0 }
 0x1d8   :  { %v570_v7 = vpop.permute.xlu0 %569 }
 0x1d9   :  { %v413_v15 = vmul.f32 1.442695, %v406_v5  ;;  %v405_v19 = vsub.f32 %v2938_v51, %v401_v6  ;;  %2322 = vmatprep.subr.mxu0 %v570_v7 }
 0x1da   :  { %v2506_v20 = vpop.eup %2505  ;;  %2323 = vmatpush3.msra.mxu0 %v570_v7 }
 0x1db   :  { %v2508_v22 = vpop.eup %2507  ;;  %v411_v23 = vmul.f32 1.442695, %v405_v19  ;;  %2316 = vmatprep.mubr.msk.f32.mxu1 %vm165_vm0, %v2506_v20  ;;  %2324 = vmatprep.subr.mxu0 %v568_v21  ;;  %2509 = vpow2.f32 %v413_v15  ;;  %v2746_v15 = vmov 0.0  }
 0x1dc   :  { %2317 = vmatmul.mubr.msk.f32.vlgmr.msra.gmra.mxu1 %vm165_vm0, %v2508_v22  ;;  %2325 = vmatpush3.msra.mxu0 %v568_v21  ;;  %v798_v19 = vpop.permute.xlu0 %797 }
 0x1dd   :  { %2511 = vpow2.f32 %v411_v23  ;;  %2332 = vmatprep.subr.mxu1 %v2746_v15  ;;  %2353 = vmatprep.subr.mxu0 %v2746_v15 }
 0x1e8   :  { %v2510_v45 = vpop.eup %2509 }
 0x1ea   :  { %v2512_v26 = vpop.eup %2511 }
 0x1eb   :  { %2319 = vmatprep.mubr.msk.f32.mxu1 %vm165_vm0, %v2512_v26 }
 0x1ec   :  { %2320 = vmatmul.mubr.msk.f32.gmra.mxu1 %vm165_vm0, %v2510_v45 }
 0x1ed   :  { %2340 = vmatprep.mubr.msk.f32.mxu1 %vm2747_vm10, %v2746_v15 }
 0x29c   :  { %v2318_v51 = vpop.f32.mrf.mxu1 }
 0x29d   :  { %2513 = vrcp.f32 %v2318_v51  ;;  %v3054_v51 = vld [vmem:[#allocation14 + $0x10] sm:$0xff] }
 0x29e   :  { %v493_v30 = vpop.f32.mrf.mxu1 }
 0x29f   :  { %2515 = vrcp.f32 %v493_v30 }
 0x2aa   :  { %v2514_v31 = vpop.eup %2513 }
 0x2ab   :  { %v3022_v32 = vmul.f32 %v2514_v31, %v2508_v22  ;;  %v3057_v31 = vld [vmem:[#allocation14 + $0x8] sm:$0xff] }
 0x2ac   :  { %v2516_v33 = vpop.eup %2515  ;;  %v2321_v34 = vpop.f32.mrf.mxu1 }
 0x2ad   :  { %2517 = vrcp.f32 %v2321_v34  ;;  %v3024_v35 = vmul.f32 %v2516_v33, %v2506_v20  ;;  %v521_v39 = vsel %vm165_vm0, %v3022_v32, 0.0  ;;  %v796_v20 = vpop.permute.xlu0 %795 }
 0x2ae   :  { %v503_v37 = vpop.f32.mrf.mxu1 }
 0x2af   :  { %2519 = vrcp.f32 %v503_v37  ;;  %v520_v38 = vsel %vm165_vm0, %v3024_v35, 0.0 }
 0x2b0   :  { %v522_v40 = vadd.f32 %v521_v39, %v520_v38  ;;  %v3060_v38 = vld [vmem:[#allocation14] sm:$0xff] }
 0x2b2   :  { %v523_v41 = vrot.slane %v522_v40, 4 }
 0x2b4   :  { %v524_v42 = vadd.f32 %v523_v41, %v522_v40  ;;  %v156_v41 = vld [vmem:[%s3294_s8] sm:$0xff]  ;;  %s2748_s8 = smov 32  }
 0x2b6   :  { %v525_v44 = vrot.slane %v524_v42, 2 }
 0x2b8   :  { %v526_v14 = vadd.f32 %v525_v44, %v524_v42 }
 0x2ba   :  { %v2518_v46 = vpop.eup %2517  ;;  %v527_v47 = vrot.slane %v526_v14, 1 }
 0x2bb   :  { %v3030_v48 = vmul.f32 %v2518_v46, %v2510_v45  ;;  %v3052_v45 = vld [vmem:[#allocation14 + $0x18] sm:$0xff] }
 0x2bc   :  { %v2520_v49 = vpop.eup %2519  ;;  %v528_v50 = vadd.f32 %v527_v47, %v526_v14 }
 0x2bd   :  { %v3032_v52 = vmul.f32 %v2520_v49, %v2512_v26  ;;  %v749_v55 = vsel %vm165_vm0, %v3030_v48, 0.0 }
 0x2be   :  { %v529_v53 = vadd.f32 1e-05, %v528_v50 }
 0x2bf   :  { %v748_v54 = vsel %vm165_vm0, %v3032_v52, 0.0 }
 0x2c0   :  { %2521 = vrcp.f32 %v529_v53  ;;  %v750_v56 = vadd.f32 %v749_v55, %v748_v54 }
 0x2c2   :  { %v751_v57 = vrot.slane %v750_v56, 4 }
 0x2c4   :  { %v752_v58 = vadd.f32 %v751_v57, %v750_v56 }
 0x2c6   :  { %v753_v25 = vrot.slane %v752_v58, 2 }
 0x2c8   :  { %v754_v59 = vadd.f32 %v753_v25, %v752_v58 }
 0x2ca   :  { %v755_v60 = vrot.slane %v754_v59, 1 }
 0x2cc   :  { %v756_v29 = vadd.f32 %v755_v60, %v754_v59 }
 0x2cd   :  { %v2522_v61 = vpop.eup %2521 }
 0x2ce   :  { %v531_v62 = vmul.f32 %v2522_v61, %v3024_v35  ;;  %v757_v63 = vadd.f32 1e-05, %v756_v29  ;;  %v532_v0 = vmul.f32 %v2522_v61, %v3022_v32 }
 0x2d0   :  { %533 = vxpose.xlu1.b32.start [1/2] (short) (narrow) %v531_v62, 32  ;;  %2523 = vrcp.f32 %v757_v63 }
 0x2d4   :  { %534 = vxpose.xlu1.b32.end [2/2] (short) (narrow) %v532_v0, 32 }
 0x2dd   :  { %v2524_v1 = vpop.eup %2523 }
 0x2de   :  { %v759_v2 = vmul.f32 %v2524_v1, %v3032_v52  ;;  %v760_v3 = vmul.f32 %v2524_v1, %v3030_v48 }
 0x2e0   :  { %761 = vxpose.xlu0.b32.start [1/2] (short) (narrow) %v759_v2, 32 }
 0x2e4   :  { %762 = vxpose.xlu0.b32.end [2/2] (short) (narrow) %v760_v3, 32 }
 0x34c   :  { %v549_v4 = vpop.trf.xlu1 }
 0x34d   :  { %2326 = vmatprep.mubr.msk.f32.mxu0 %vm573_vm9, %v549_v4  ;;  %v1001_v4 = vsub.s32 2, %v2869_v13 }
 0x350   :  { %v550_v5 = vpop.trf.xlu1 }
 0x351   :  { %2327 = vmatmul.mubr.msk.f32.vlgmr.msra.gmra.mxu0 %vm573_vm9, %v550_v5  ;;  %v1007_v5 = vsub.s32 3, %v2869_v13 }
 0x354   :  { %v551_v6 = vpop.trf.xlu1 }
 0x355   :  { %2329 = vmatprep.mubr.msk.f32.mxu0 %vm573_vm9, %v551_v6  ;;  %v1002_v6 = vrot.slane %v2876_v17, %v1001_v4 }
 0x358   :  { %v552_v7 = vpop.trf.xlu1 }
 0x359   :  { %2330 = vmatmul.mubr.msk.f32.gmra.mxu0 %vm573_vm9, %v552_v7 }
 0x35a   :  { %2361 = vmatprep.mubr.msk.f32.mxu0 %vm2747_vm10, %v2746_v15 }
 0x35c   :  { %v777_v22 = vpop.trf.xlu0 }
 0x360   :  { %v778_v37 = vpop.trf.xlu0 }
 0x364   :  { %v779_v42 = vpop.trf.xlu0 }
 0x368   :  { %v780_v44 = vpop.trf.xlu0 }
 0x411   :  { %v2328_v21 = vpop.f32.mrf.mxu0 }
 0x412   :  { %v672_v39 = vmul.f32 %v2328_v21, %v3057_v31 }
 0x413   :  { %v652_v23 = vpop.f32.mrf.mxu0 }
 0x414   :  { %v671_v40 = vmul.f32 %v652_v23, %v3060_v38 }
 0x419   :  { %v2331_v26 = vpop.f32.mrf.mxu0 }
 0x41a   :  { %v674_v30 = vmul.f32 %v2331_v26, %v3052_v45 }
 0x41b   :  { %v662_v33 = vpop.f32.mrf.mxu0 }
 0x41c   :  { %v673_v34 = vmul.f32 %v662_v33, %v3054_v51  ;;  %2333 = vmatpush3.msra.mxu1 %v674_v30 }
 0x41d   :  { %2334 = vmatprep.subr.mxu1 %v2746_v15 }
 0x41e   :  { %2335 = vmatpush3.msra.mxu1 %v673_v34 }
 0x41f   :  { %2336 = vmatprep.subr.mxu1 %v2746_v15 }
 0x420   :  { %2337 = vmatpush3.msra.mxu1 %v672_v39  ;;  %v1013_v39 = vld [vmem:[#allocation7 + $0x10] sm:$0xff] }
 0x421   :  { %2338 = vmatprep.subr.mxu1 %v2746_v15 }
 0x422   :  { %2339 = vmatpush3.msra.mxu1 %v671_v40  ;;  %v1012_v40 = vld [vmem:[#allocation7 + $0x8] sm:$0xff] }
 0x423   :  { %2341 = vmatmul.mubr.msk.f32.vlgmr.msra.gmra.mxu1 %vm165_vm0, %v156_v41  ;;  %2343 = vmatprep.subr.mxu1 %v798_v19 }
 0x424   :  { %2344 = vmatpush3.msra.mxu1 %v798_v19  ;;  %2347 = vmatprep.mubr.msk.f32.mxu1 %vm573_vm9, %v777_v22 }
 0x425   :  { %2345 = vmatprep.subr.mxu1 %v796_v20 }
 0x426   :  { %2346 = vmatpush3.msra.mxu1 %v796_v20  ;;  %v1008_v20 = vrot.slane %v2876_v17, %v1007_v5 }
 0x427   :  { %2348 = vmatmul.mubr.msk.f32.vlgmr.msra.gmra.mxu1 %vm573_vm9, %v778_v37  ;;  %v1014_v37 = vld [vmem:[#allocation7 + $0x18] sm:$0xff] }
 0x428   :  { %2350 = vmatprep.mubr.msk.f32.mxu1 %vm573_vm9, %v779_v42  ;;  %2364 = vmatprep.subr.mxu1 %v1014_v37 }
 0x429   :  { %2365 = vmatpush3.msra.mxu1 %v1014_v37 }
 0x42a   :  { %2366 = vmatprep.subr.mxu1 %v1013_v39 }
 0x42b   :  { %2351 = vmatmul.mubr.msk.f32.gmra.mxu1 %vm573_vm9, %v780_v44 }
 0x42c   :  { %2367 = vmatpush3.msra.mxu1 %v1013_v39 }
 0x42d   :  { %2368 = vmatprep.subr.mxu1 %v1012_v40 }
 0x42e   :  { %2369 = vmatpush3.msra.mxu1 %v1012_v40 }
 0x4e3   :  { %v744_v14 = vpop.f32.mrf.mxu1 }
 0x4e4   :  { %v972_v46 = vsel %vm165_vm0, %v744_v14, 0.0 }
 0x4e5   :  { %973 = vadd.xlane.f32.xlu1 %v972_v46  ;;  %v2342_v47 = vpop.f32.mrf.mxu1 }
 0x4e7   :  { %v2349_v49 = vpop.f32.mrf.mxu1 }
 0x4e8   :  { %v899_v57 = vmul.f32 %v2349_v49, %v3057_v31 }
 0x4e9   :  { %v879_v50 = vpop.f32.mrf.mxu1 }
 0x4ea   :  { %v898_v58 = vmul.f32 %v879_v50, %v3060_v38 }
 0x4eb   :  { %v2352_v53 = vpop.f32.mrf.mxu1 }
 0x4ec   :  { %v901_v54 = vmul.f32 %v2352_v53, %v3052_v45 }
 0x4ed   :  { %v889_v55 = vpop.f32.mrf.mxu1 }
 0x4ee   :  { %v900_v56 = vmul.f32 %v889_v55, %v3054_v51  ;;  %2354 = vmatpush3.msra.mxu0 %v901_v54  ;;  %v1017_v54 = vsub.s32 1, %v2869_v13 }
 0x4ef   :  { %2355 = vmatprep.subr.mxu0 %v2746_v15 }
 0x4f0   :  { %2356 = vmatpush3.msra.mxu0 %v900_v56  ;;  %v1018_v56 = vrot.slane %v2876_v17, %v1017_v54 }
 0x4f1   :  { %2357 = vmatprep.subr.mxu0 %v2746_v15 }
 0x4f2   :  { %2358 = vmatpush3.msra.mxu0 %v899_v57 }
 0x4f3   :  { %2359 = vmatprep.subr.mxu0 %v2746_v15 }
 0x4f4   :  { %2360 = vmatpush3.msra.mxu0 %v898_v58 }
 0x4f5   :  { %2362 = vmatmul.mubr.msk.f32.vlgmr.msra.gmra.mxu0 %vm165_vm0, %v156_v41  ;;  %2375 = vmatprep.subr.mxu0 %v2746_v15  ;;  %v1011_v41 = vld [vmem:[#allocation7] sm:$0xff] }
 0x4f6   :  { %2383 = vmatprep.mubr.msk.f32.mxu0 %vm2747_vm10, %v2746_v15  ;;  %2370 = vmatprep.subr.mxu1 %v1011_v41 }
 0x4f7   :  { %2371 = vmatpush3.msra.mxu1 %v1011_v41 }
 0x4f8   :  { %2386 = vmatprep.subr.mxu1 %v2746_v15 }
 0x56e   :  { %v974_v25 = vpop.xlane.xlu1 %973 }
 0x56f   :  { %v979_v59 = vmul.f32 0.03125, %v974_v25 }
 0x571   :  { %v981_v60 = vsub.f32 %v744_v14, %v979_v59 }
 0x573   :  { %v983_v29 = vmul.f32 %v981_v60, %v981_v60 }
 0x575   :  { %v985_v61 = vsel %vm165_vm0, %v983_v29, 0.0 }
 0x576   :  { %986 = vadd.xlane.f32.xlu1 %v985_v61 }
 0x5b5   :  { %v968_v62 = vpop.f32.mrf.mxu0 }
 0x5b6   :  { %v975_v63 = vsel %vm165_vm0, %v968_v62, 0.0 }
 0x5b7   :  { %976 = vadd.xlane.f32.xlu0 %v975_v63  ;;  %v2363_v0 = vpop.f32.mrf.mxu0 }
 0x5cd   :  { %1110 = vrot.lane.b32.xlu0 %v3052_v45, %s2748_s8 }
 0x5ff   :  { %v987_v1 = vpop.xlane.xlu1 %986 }
 0x600   :  { %v991_v2 = vmul.f32 0.03125, %v987_v1 }
 0x602   :  { %v993_v3 = vadd.f32 1e-05, %v991_v2 }
 0x604   :  { %2525 = vrsqrt.f32 %v993_v3 }
 0x611   :  { %v2526_v7 = vpop.eup %2525 }
 0x612   :  { %v997_v19 = vmul.f32 %v2526_v7, %v981_v60 }
 0x614   :  { %v1003_v21 = vmul.f32 %v1002_v6, %v997_v19 }
 0x616   :  { %v3093_v22 = vadd.f32 %v1008_v20, %v1003_v21 }
 0x618   :  { %2372 = vmatprep.mubr.msk.f32.mxu1 %vm165_vm0, %v3093_v22 }
 0x640   :  { %v977_v23 = vpop.xlane.xlu0 %976 }
 0x641   :  { %v980_v26 = vmul.f32 0.03125, %v977_v23 }
 0x643   :  { %v982_v30 = vsub.f32 %v968_v62, %v980_v26 }
 0x644   :  { %v1111_v59 = vpop.permute.xlu0 %1110 }
 0x645   :  { %v984_v33 = vmul.f32 %v982_v30, %v982_v30 }
 0x647   :  { %v988_v34 = vsel %vm165_vm0, %v984_v33, 0.0 }
 0x648   :  { %989 = vadd.xlane.f32.xlu1 %v988_v34 }
 0x659   :  { %1108 = vrot.lane.b32.xlu1 %v3054_v51, %s2748_s8 }
 0x65d   :  { %1106 = vrot.lane.b32.xlu1 %v3057_v31, %s2748_s8 }
 0x661   :  { %1104 = vrot.lane.b32.xlu1 %v3060_v38, %s2748_s8 }
 0x6d1   :  { %v990_v42 = vpop.xlane.xlu1 %989 }
 0x6d2   :  { %v992_v44 = vmul.f32 0.03125, %v990_v42 }
 0x6d4   :  { %v994_v14 = vadd.f32 1e-05, %v992_v44 }
 0x6d5   :  { %v1109_v53 = vpop.permute.xlu1 %1108 }
 0x6d6   :  { %2527 = vrsqrt.f32 %v994_v14 }
 0x6d9   :  { %v1107_v57 = vpop.permute.xlu1 %1106 }
 0x6dd   :  { %v1105_v61 = vpop.permute.xlu1 %1104 }
 0x6e3   :  { %v2528_v46 = vpop.eup %2527 }
 0x6e4   :  { %v998_v47 = vmul.f32 %v2528_v46, %v982_v30 }
 0x6e6   :  { %v1004_v49 = vmul.f32 %v1002_v6, %v998_v47 }
 0x6e8   :  { %v3103_v50 = vadd.f32 %v1008_v20, %v1004_v49 }
 0x6ea   :  { %2373 = vmatmul.mubr.msk.f32.vlgmr.msra.gmra.mxu1 %vm165_vm0, %v3103_v50 }
 0x6eb   :  { %2387 = vmatpush3.msra.mxu1 %v2853_v8  ;;  %2394 = vmatprep.mubr.msk.f32.mxu1 %vm2747_vm10, %v2746_v15 }
 0x6ec   :  { %2388 = vmatprep.subr.mxu1 %v2746_v15 }
 0x6ed   :  { %2389 = vmatpush3.msra.mxu1 %v2856_v9 }
 0x6ee   :  { %2390 = vmatprep.subr.mxu1 %v2746_v15 }
 0x6ef   :  { %2391 = vmatpush3.msra.mxu1 %v2860_v10 }
 0x6f0   :  { %2392 = vmatprep.subr.mxu1 %v2746_v15 }
 0x6f1   :  { %2393 = vmatpush3.msra.mxu1 %v2864_v11 }
 0x6f2   :  { %2397 = vmatprep.subr.mxu1 %v2746_v15 }
 0x7aa   :  { %v2374_v55 = vpop.f32.mrf.mxu1 }
 0x7ab   :  { %v3125_v62 = vadd.f32 %v2374_v55, %v1018_v56 }
 0x7ac   :  { %v1091_v58 = vpop.f32.mrf.mxu1 }
 0x7ad   :  { %v3119_v25 = vadd.f32 %v1091_v58, %v1018_v56  ;;  %v1424_v0 = vmul.f32 %v1111_v59, %v3125_v62  ;;  %v1423_v1 = vmul.f32 %v1109_v53, %v3125_v62  ;;  %v1421_v2 = vmul.f32 %v1105_v61, %v3125_v62 }
 0x7ae   :  { %v1422_v3 = vmul.f32 %v1107_v57, %v3125_v62 }
 0x7af   :  { %v1119_v60 = vmul.f32 %v1111_v59, %v3119_v25  ;;  %v1118_v29 = vmul.f32 %v1109_v53, %v3119_v25  ;;  %v1116_v63 = vmul.f32 %v1105_v61, %v3119_v25  ;;  %v1117_v17 = vmul.f32 %v1107_v57, %v3119_v25 }
 0x7b1   :  { %1144 = vrot.lane.b32.xlu1 %v1118_v29, %s2745_s6  ;;  %1146 = vrot.lane.b32.xlu0 %v1119_v60, %s2745_s6 }
 0x7b5   :  { %1140 = vrot.lane.b32.xlu1 %v1116_v63, %s2745_s6  ;;  %1142 = vrot.lane.b32.xlu0 %v1117_v17, %s2745_s6 }
 0x7b9   :  { %1437 = vrot.lane.b32.xlu1 %v1423_v1, %s2745_s6  ;;  %1439 = vrot.lane.b32.xlu0 %v1424_v0, %s2745_s6 }
 0x7bd   :  { %1433 = vrot.lane.b32.xlu1 %v1421_v2, %s2745_s6  ;;  %1435 = vrot.lane.b32.xlu0 %v1422_v3, %s2745_s6 }
 0x823   :  { %v1147_v4 = vpop.permute.xlu0 %1146  ;;  %v1145_v5 = vpop.permute.xlu1 %1144 }
 0x824   :  { %2376 = vmatpush3.xpose.msk.msra.mxu0 %vm165_vm0, %v1147_v4 }
 0x825   :  { %2377 = vmatprep.subr.mxu0 %v2746_v15 }
 0x827   :  { %v1143_v6 = vpop.permute.xlu0 %1142  ;;  %v1141_v7 = vpop.permute.xlu1 %1140 }
 0x828   :  { %2378 = vmatpush3.xpose.msk.msra.mxu0 %vm165_vm0, %v1145_v5 }
 0x829   :  { %2379 = vmatprep.subr.mxu0 %v2746_v15 }
 0x82b   :  { %v1440_v19 = vpop.permute.xlu0 %1439  ;;  %v1438_v20 = vpop.permute.xlu1 %1437 }
 0x82c   :  { %2380 = vmatpush3.xpose.msk.msra.mxu0 %vm165_vm0, %v1143_v6 }
 0x82d   :  { %2381 = vmatprep.subr.mxu0 %v2746_v15 }
 0x82f   :  { %v1436_v21 = vpop.permute.xlu0 %1435  ;;  %v1434_v23 = vpop.permute.xlu1 %1433 }
 0x830   :  { %2382 = vmatpush3.xpose.msk.msra.mxu0 %vm165_vm0, %v1141_v7 }
 0x831   :  { %2408 = vmatprep.subr.mxu0 %v2746_v15 }
 0x833   :  { %2384 = vmatmul.mubr.msk.f32.vlgmr.msra.gmra.mxu0 %vm165_vm0, %v3119_v25 }
 0x834   :  { %2409 = vmatpush3.xpose.msk.msra.mxu0 %vm165_vm0, %v1440_v19  ;;  %2416 = vmatprep.mubr.msk.f32.mxu0 %vm2747_vm10, %v2746_v15 }
 0x835   :  { %2410 = vmatprep.subr.mxu0 %v2746_v15 }
 0x838   :  { %2411 = vmatpush3.xpose.msk.msra.mxu0 %vm165_vm0, %v1438_v20 }
 0x839   :  { %2412 = vmatprep.subr.mxu0 %v2746_v15 }
 0x83c   :  { %2413 = vmatpush3.xpose.msk.msra.mxu0 %vm165_vm0, %v1436_v21 }
 0x83d   :  { %2414 = vmatprep.subr.mxu0 %v2746_v15 }
 0x840   :  { %2415 = vmatpush3.xpose.msk.msra.mxu0 %vm165_vm0, %v1434_v23 }
 0x843   :  { %2417 = vmatmul.mubr.msk.f32.vlgmr.msra.gmra.mxu0 %vm165_vm0, %v3125_v62 }
 0x8f3   :  { %v1225_v26 = vpop.f32.mrf.mxu0 }
 0x8f4   :  { %v1229_v30 = vmul.f32 0.35355338, %v1225_v26 }
 0x8f5   :  { %v2385_v33 = vpop.f32.mrf.mxu0 }
 0x8f6   :  { %v1236_v34 = vsel %vm2890_vm6, %v1229_v30, -1e+30  ;;  %v1230_v37 = vsel %vm2883_vm4, %v1229_v30, -1e+30  ;;  %v1242_v41 = vsel %vm2908_vm7, %v1229_v30, -1e+30 }
 0x8f7   :  { %v1237_v39 = vsel %vm165_vm0, %v1236_v34, -inf  ;;  %v1231_v40 = vsel %vm165_vm0, %v1230_v37, -inf  ;;  %v1243_v42 = vsel %vm165_vm0, %v1242_v41, -inf  ;;  %v1248_v44 = vsel %vm2921_vm8, %v1229_v30, -1e+30 }
 0x8f8   :  { %1238 = vmax.xlane.f32.xlu1 %v1237_v39  ;;  %1232 = vmax.xlane.f32.xlu0 %v1231_v40  ;;  %v1249_v14 = vsel %vm165_vm0, %v1248_v44, -inf }
 0x8fc   :  { %1244 = vmax.xlane.f32.xlu0 %v1243_v42 }
 0x900   :  { %1250 = vmax.xlane.f32.xlu0 %v1249_v14 }
 0x903   :  { %v1518_v46 = vpop.f32.mrf.mxu0 }
 0x904   :  { %v3180_v49 = vmul.f32 0.35355338, %v1518_v46 }
 0x905   :  { %v2418_v47 = vpop.f32.mrf.mxu0 }
 0x906   :  { %v1529_v53 = vsel %vm2890_vm6, %v3180_v49, -1e+30  ;;  %v1523_v54 = vsel %vm2883_vm4, %v3180_v49, -1e+30  ;;  %v1535_v57 = vsel %vm2908_vm7, %v3180_v49, -1e+30 }
 0x907   :  { %v1530_v55 = vsel %vm165_vm0, %v1529_v53, -inf  ;;  %v1524_v56 = vsel %vm165_vm0, %v1523_v54, -inf  ;;  %v1536_v58 = vsel %vm165_vm0, %v1535_v57, -inf  ;;  %v1541_v27 = vsel %vm2921_vm8, %v3180_v49, -1e+30 }
 0x908   :  { %v1542_v24 = vsel %vm165_vm0, %v1541_v27, -inf }
 0x909   :  { %1124 = vrot.lane.b32.xlu1 %v3054_v51, %s2749_s26 }
 0x90d   :  { %1122 = vrot.lane.b32.xlu1 %v3057_v31, %s2749_s26 }
 0x911   :  { %1120 = vrot.lane.b32.xlu1 %v3060_v38, %s2749_s26 }
 0x916   :  { %1126 = vrot.lane.b32.xlu0 %v3052_v45, %s2749_s26 }
 0x935   :  { %1531 = vmax.xlane.f32.xlu1 %v1530_v55  ;;  %1525 = vmax.xlane.f32.xlu0 %v1524_v56 }
 0x939   :  { %1537 = vmax.xlane.f32.xlu0 %v1536_v58 }
 0x93d   :  { %1543 = vmax.xlane.f32.xlu0 %v1542_v24 }
 0x981   :  { %v1239_v59 = vpop.xlane.xlu1 %1238  ;;  %v1233_v60 = vpop.xlane.xlu0 %1232 }
 0x982   :  { %v1240_v29 = vmul.f32 %v1239_v59, %v2984_v12  ;;  %v1234_v61 = vmul.f32 %v1233_v60, %v2988_v16 }
 0x984   :  { %v1241_v1 = vadd.f32 %v1240_v29, %v1234_v61  ;;  %v1715_v29 = vld [vmem:[#allocation8 + $0x8] sm:$0xff]  ;;  %v1714_v61 = vld [vmem:[#allocation8] sm:$0xff] }
 0x985   :  { %v1125_v63 = vpop.permute.xlu1 %1124  ;;  %v1245_v17 = vpop.xlane.xlu0 %1244 }
 0x986   :  { %v1134_v36 = vmul.f32 %v1125_v63, %v3119_v25  ;;  %v1246_v0 = vmul.f32 %v1245_v17, %v2992_v18  ;;  %v1427_v33 = vmul.f32 %v1125_v63, %v3125_v62 }
 0x988   :  { %1340 = vrot.lane.b32.xlu1 %v1134_v36, %s2749_s26  ;;  %v1247_v3 = vadd.f32 %v1246_v0, %v1241_v1 }
 0x989   :  { %v1123_v43 = vpop.permute.xlu1 %1122  ;;  %v1251_v2 = vpop.xlane.xlu0 %1250 }
 0x98a   :  { %v1133_v4 = vmul.f32 %v1123_v43, %v3119_v25  ;;  %v1252_v5 = vmul.f32 %v1251_v2, %v3000_v28 }
 0x98c   :  { %v1253_v6 = vadd.f32 %v1252_v5, %v1247_v3  ;;  %1338 = vrot.lane.b32.xlu1 %v1133_v4, %s2749_s26  ;;  %v1720_v3 = vsub.s32 7, %v2869_v13  ;;  %v1805_v4 = vsub.s32 4, %v2869_v13  ;;  %v2541_v5 = vld [vmem:[#allocation11] sm:$0xff] }
 0x98d   :  { %v1121_v7 = vpop.permute.xlu1 %1120  ;;  %v1127_v19 = vpop.permute.xlu0 %1126 }
 0x98e   :  { %v1254_v20 = vsub.f32 %v1229_v30, %v1253_v6  ;;  %v1132_v21 = vmul.f32 %v1121_v7, %v3119_v25  ;;  %v1135_v23 = vmul.f32 %v1127_v19, %v3119_v25  ;;  %v1428_v34 = vmul.f32 %v1127_v19, %v3125_v62 }
 0x98f   :  { %v1426_v30 = vmul.f32 %v1123_v43, %v3125_v62  ;;  %v1425_v37 = vmul.f32 %v1121_v7, %v3125_v62  ;;  %v1721_v6 = vrot.slane %v2541_v5, %v1720_v3  ;;  %v1806_v7 = vrot.slane %v2541_v5, %v1805_v4 }
 0x990   :  { %v1255_v26 = vmul.f32 1.442695, %v1254_v20  ;;  %1336 = vrot.lane.b32.xlu1 %v1132_v21, %s2749_s26  ;;  %1342 = vrot.lane.b32.xlu0 %v1135_v23, %s2749_s26 }
 0x991   :  { %v1808_v21 = vmul.f32 %v1806_v7, %v3103_v50 }
 0x992   :  { %2529 = vpow2.f32 %v1255_v26 }
 0x994   :  { %1633 = vrot.lane.b32.xlu1 %v1427_v33, %s2749_s26  ;;  %1635 = vrot.lane.b32.xlu0 %v1428_v34, %s2749_s26  ;;  %v1807_v33 = vmul.f32 %v1806_v7, %v3093_v22 }
 0x998   :  { %1629 = vrot.lane.b32.xlu1 %v1425_v37, %s2749_s26  ;;  %1631 = vrot.lane.b32.xlu0 %v1426_v30, %s2749_s26 }
 0x99f   :  { %v2530_v25 = vpop.eup %2529 }
 0x9a0   :  { %2395 = vmatmul.mubr.msk.f32.vlgmr.msra.gmra.mxu1 %vm165_vm0, %v2530_v25 }
 0x9a1   :  { %2405 = vmatprep.mubr.msk.f32.mxu1 %vm2747_vm10, %v2746_v15 }
 0x9be   :  { %v1532_v39 = vpop.xlane.xlu1 %1531  ;;  %v1526_v40 = vpop.xlane.xlu0 %1525 }
 0x9bf   :  { %v1533_v41 = vmul.f32 %v1532_v39, %v2984_v12  ;;  %v1527_v42 = vmul.f32 %v1526_v40, %v2988_v16 }
 0x9c1   :  { %v1534_v44 = vadd.f32 %v1533_v41, %v1527_v42 }
 0x9c2   :  { %v1538_v14 = vpop.xlane.xlu0 %1537 }
 0x9c3   :  { %v1539_v62 = vmul.f32 %v1538_v14, %v2992_v18 }
 0x9c5   :  { %v1540_v46 = vadd.f32 %v1539_v62, %v1534_v44 }
 0x9c6   :  { %v1544_v47 = vpop.xlane.xlu0 %1543 }
 0x9c7   :  { %v1545_v53 = vmul.f32 %v1544_v47, %v3000_v28 }
 0x9c9   :  { %v1546_v54 = vadd.f32 %v1545_v53, %v1540_v46 }
 0x9cb   :  { %v1547_v28 = vsub.f32 %v3180_v49, %v1546_v54 }
 0x9cd   :  { %v1548_v58 = vmul.f32 1.442695, %v1547_v28 }
 0x9fa   :  { %v1341_v55 = vpop.permute.xlu1 %1340 }
 0x9fe   :  { %v1339_v56 = vpop.permute.xlu1 %1338 }
 0xa02   :  { %v1343_v57 = vpop.permute.xlu0 %1342  ;;  %v1337_v12 = vpop.permute.xlu1 %1336 }
 0xa03   :  { %2398 = vmatpush3.msra.mxu1 %v1343_v57  ;;  %v1845_v57 = vsub.s32 6, %v2869_v13 }
 0xa04   :  { %2399 = vmatprep.subr.mxu1 %v2746_v15 }
 0xa05   :  { %2400 = vmatpush3.msra.mxu1 %v1341_v55  ;;  %v1846_v28 = vrot.slane %v2541_v5, %v1845_v57 }
 0xa06   :  { %2401 = vmatprep.subr.mxu1 %v2746_v15  ;;  %v1636_v49 = vpop.permute.xlu0 %1635  ;;  %v1634_v60 = vpop.permute.xlu1 %1633 }
 0xa07   :  { %2402 = vmatpush3.msra.mxu1 %v1339_v56  ;;  %v1839_v56 = vsub.s32 5, %v2869_v13 }
 0xa08   :  { %2403 = vmatprep.subr.mxu1 %v2746_v15 }
 0xa09   :  { %2404 = vmatpush3.msra.mxu1 %v1337_v12  ;;  %v1840_v12 = vrot.slane %v2541_v5, %v1839_v56 }
 0xa0a   :  { %2419 = vmatprep.subr.mxu1 %v2746_v15 }
 0xa60   :  { %v1326_v16 = vpop.f32.mrf.mxu1 }
 0xa61   :  { %2531 = vrcp.f32 %v1326_v16 }
 0xa62   :  { %v2396_v18 = vpop.f32.mrf.mxu1  ;;  %2533 = vpow2.f32 %v1548_v58 }
 0xa6e   :  { %v2532_v27 = vpop.eup %2531 }
 0xa6f   :  { %v1331_v24 = vmul.f32 %v2532_v27, %v2530_v25  ;;  %v2534_v59 = vpop.eup %2533 }
 0xa71   :  { %2406 = vmatmul.mubr.msk.f32.vlgmr.msra.gmra.mxu1 %vm165_vm0, %v1331_v24 }
 0xa72   :  { %2420 = vmatpush3.msra.mxu1 %v2853_v8  ;;  %2427 = vmatprep.mubr.msk.f32.mxu1 %vm2747_vm10, %v2746_v15  ;;  %v1632_v8 = vpop.permute.xlu0 %1631 }
 0xa73   :  { %2421 = vmatprep.subr.mxu1 %v2746_v15 }
 0xa74   :  { %2422 = vmatpush3.msra.mxu1 %v2856_v9  ;;  %v1630_v9 = vpop.permute.xlu1 %1629 }
 0xa75   :  { %2423 = vmatprep.subr.mxu1 %v2746_v15 }
 0xa76   :  { %2424 = vmatpush3.msra.mxu1 %v2860_v10  ;;  %v1717_v10 = vld [vmem:[#allocation8 + $0x18] sm:$0xff] }
 0xa77   :  { %2425 = vmatprep.subr.mxu1 %v2746_v15  ;;  %2441 = vmatprep.subr.mxu0 %v1717_v10 }
 0xa78   :  { %2426 = vmatpush3.msra.mxu1 %v2864_v11  ;;  %v1716_v11 = vld [vmem:[#allocation8 + $0x10] sm:$0xff]  ;;  %2442 = vmatpush3.msra.mxu0 %v1717_v10 }
 0xa79   :  { %2428 = vmatmul.mubr.msk.f32.vlgmr.msra.gmra.mxu1 %vm165_vm0, %v2534_v59  ;;  %2430 = vmatprep.subr.mxu1 %v2746_v15 }
 0xa7a   :  { %2431 = vmatpush3.msra.mxu1 %v1636_v49  ;;  %2438 = vmatprep.mubr.msk.f32.mxu1 %vm2747_vm10, %v2746_v15 }
 0xa7b   :  { %2432 = vmatprep.subr.mxu1 %v2746_v15  ;;  %2443 = vmatprep.subr.mxu0 %v1716_v11 }
 0xa7c   :  { %2433 = vmatpush3.msra.mxu1 %v1634_v60  ;;  %2444 = vmatpush3.msra.mxu0 %v1716_v11 }
 0xa7d   :  { %2434 = vmatprep.subr.mxu1 %v2746_v15  ;;  %2445 = vmatprep.subr.mxu0 %v1715_v29 }
 0xa7e   :  { %2435 = vmatpush3.msra.mxu1 %v1632_v8  ;;  %2446 = vmatpush3.msra.mxu0 %v1715_v29 }
 0xa7f   :  { %2436 = vmatprep.subr.mxu1 %v2746_v15  ;;  %2447 = vmatprep.subr.mxu0 %v1714_v61 }
 0xa80   :  { %2437 = vmatpush3.msra.mxu1 %v1630_v9  ;;  %2448 = vmatpush3.msra.mxu0 %v1714_v61 }
 0xb31   :  { %v1417_v63 = vpop.f32.mrf.mxu1 }
 0xb32   :  { %2449 = vmatprep.mubr.msk.f32.mxu0 %vm165_vm0, %v1417_v63  ;;  %v2022_v63 = vld [vmem:[#allocation10 + $0x18] sm:$0xff] }
 0xb33   :  { %v2407_v17 = vpop.f32.mrf.mxu1 }
 0xb34   :  { %v2021_v17 = vld [vmem:[#allocation10 + $0x10] sm:$0xff] }
 0xb39   :  { %v1619_v36 = vpop.f32.mrf.mxu1 }
 0xb3a   :  { %2535 = vrcp.f32 %v1619_v36 }
 0xb3b   :  { %v2429_v15 = vpop.f32.mrf.mxu1 }
 0xb47   :  { %v2536_v0 = vpop.eup %2535 }
 0xb48   :  { %v1624_v1 = vmul.f32 %v2536_v0, %v2534_v59 }
 0xb4a   :  { %2439 = vmatmul.mubr.msk.f32.vlgmr.msra.gmra.mxu1 %vm165_vm0, %v1624_v1 }
 0xb4b   :  { %2460 = vmatprep.mubr.msk.f32.mxu1 %vm165_vm0, %v3024_v35 }
 0xc0a   :  { %v1710_v43 = vpop.f32.mrf.mxu1 }
 0xc0b   :  { %2450 = vmatmul.mubr.msk.f32.vlgmr.msra.gmra.mxu0 %vm165_vm0, %v1710_v43 }
 0xc0c   :  { %v2440_v2 = vpop.f32.mrf.mxu1  ;;  %2471 = vmatprep.mubr.msk.f32.mxu0 %vm165_vm0, %v3032_v52 }
 0xccb   :  { %v2451_v19 = vpop.f32.mrf.mxu0 }
 0xccc   :  { %v1800_v20 = vadd.f32 %v2451_v19, %v1721_v6 }
 0xccd   :  { %v1794_v23 = vpop.f32.mrf.mxu0 }
 0xcce   :  { %v1795_v35 = vadd.f32 %v1794_v23, %v1721_v6  ;;  %v1810_v26 = vadd.f32 %v1808_v21, %v1800_v20 }
 0xcd0   :  { %v1814_v34 = vsel %vm165_vm0, %v1810_v26, 0.0  ;;  %v1809_v30 = vadd.f32 %v1807_v33, %v1795_v35 }
 0xcd1   :  { %1815 = vadd.xlane.f32.xlu1 %v1814_v34 }
 0xcd2   :  { %v1811_v52 = vsel %vm165_vm0, %v1809_v30, 0.0 }
 0xcd3   :  { %1812 = vadd.xlane.f32.xlu0 %v1811_v52 }
 0xd5a   :  { %v1816_v37 = vpop.xlane.xlu1 %1815 }
 0xd5b   :  { %v1818_v25 = vmul.f32 0.03125, %v1816_v37 }
 0xd5c   :  { %v1813_v39 = vpop.xlane.xlu0 %1812 }
 0xd5d   :  { %v1817_v40 = vmul.f32 0.03125, %v1813_v39  ;;  %v1820_v41 = vsub.f32 %v1810_v26, %v1818_v25 }
 0xd5f   :  { %v1819_v42 = vsub.f32 %v1809_v30, %v1817_v40  ;;  %v1822_v14 = vmul.f32 %v1820_v41, %v1820_v41 }
 0xd61   :  { %v1821_v44 = vmul.f32 %v1819_v42, %v1819_v42  ;;  %v1826_v22 = vsel %vm165_vm0, %v1822_v14, 0.0 }
 0xd63   :  { %v1823_v50 = vsel %vm165_vm0, %v1821_v44, 0.0 }
 0xd64   :  { %1824 = vadd.xlane.f32.xlu0 %v1823_v50 }
 0xd68   :  { %1827 = vadd.xlane.f32.xlu0 %v1826_v22 }
 0xded   :  { %v1825_v62 = vpop.xlane.xlu0 %1824 }
 0xdee   :  { %v1829_v46 = vmul.f32 0.03125, %v1825_v62 }
 0xdf0   :  { %v1831_v47 = vadd.f32 1e-05, %v1829_v46 }
 0xdf1   :  { %v1828_v53 = vpop.xlane.xlu0 %1827 }
 0xdf2   :  { %2537 = vrsqrt.f32 %v1831_v47  ;;  %v1830_v54 = vmul.f32 0.03125, %v1828_v53 }
 0xdf4   :  { %v1832_v55 = vadd.f32 1e-05, %v1830_v54 }
 0xdf6   :  { %2539 = vrsqrt.f32 %v1832_v55 }
 0xdff   :  { %v2538_v16 = vpop.eup %2537 }
 0xe00   :  { %v1835_v18 = vmul.f32 %v2538_v16, %v1819_v42 }
 0xe02   :  { %v1841_v58 = vmul.f32 %v1840_v12, %v1835_v18 }
 0xe03   :  { %v2540_v27 = vpop.eup %2539 }
 0xe04   :  { %v1836_v24 = vmul.f32 %v2540_v27, %v1820_v41  ;;  %v1847_v49 = vadd.f32 %v1846_v28, %v1841_v58 }
 0xe06   :  { %v1852_v59 = vmul.f32 %v1847_v49, %v3052_v45  ;;  %v1842_v60 = vmul.f32 %v1840_v12, %v1836_v24  ;;  %v1851_v8 = vmul.f32 %v1847_v49, %v3054_v51  ;;  %v1850_v10 = vmul.f32 %v1847_v49, %v3057_v31 }
 0xe07   :  { %v1849_v11 = vmul.f32 %v1847_v49, %v3060_v38 }
 0xe08   :  { %2452 = vmatprep.subr.mxu1 %v1852_v59  ;;  %v1848_v9 = vadd.f32 %v1846_v28, %v1842_v60 }
 0xe09   :  { %2453 = vmatpush3.msra.mxu1 %v1852_v59 }
 0xe0a   :  { %2454 = vmatprep.subr.mxu1 %v1851_v8  ;;  %v1937_v13 = vmul.f32 %v1848_v9, %v3052_v45  ;;  %v1936_v29 = vmul.f32 %v1848_v9, %v3054_v51  ;;  %v1935_v61 = vmul.f32 %v1848_v9, %v3057_v31  ;;  %v1934_v45 = vmul.f32 %v1848_v9, %v3060_v38  ;;  %v2020_v51 = vld [vmem:[#allocation10 + $0x8] sm:$0xff]  ;;  %v2019_v31 = vld [vmem:[#allocation10] sm:$0xff] }
 0xe0b   :  { %2455 = vmatpush3.msra.mxu1 %v1851_v8 }
 0xe0c   :  { %2456 = vmatprep.subr.mxu1 %v1850_v10  ;;  %2463 = vmatprep.subr.mxu0 %v1937_v13 }
 0xe0d   :  { %2457 = vmatpush3.msra.mxu1 %v1850_v10  ;;  %2464 = vmatpush3.msra.mxu0 %v1937_v13 }
 0xe0e   :  { %2458 = vmatprep.subr.mxu1 %v1849_v11  ;;  %2465 = vmatprep.subr.mxu0 %v1936_v29 }
 0xe0f   :  { %2459 = vmatpush3.msra.mxu1 %v1849_v11  ;;  %2466 = vmatpush3.msra.mxu0 %v1936_v29 }
 0xe10   :  { %2461 = vmatmul.mubr.msk.f32.vlgmr.msra.gmra.mxu1 %vm165_vm0, %v3022_v32  ;;  %2467 = vmatprep.subr.mxu0 %v1935_v61 }
 0xe11   :  { %2468 = vmatpush3.msra.mxu0 %v1935_v61  ;;  %2474 = vmatprep.subr.mxu1 %v2022_v63 }
 0xe12   :  { %2469 = vmatprep.subr.mxu0 %v1934_v45  ;;  %2475 = vmatpush3.msra.mxu1 %v2022_v63 }
 0xe13   :  { %2470 = vmatpush3.msra.mxu0 %v1934_v45  ;;  %2476 = vmatprep.subr.mxu1 %v2021_v17 }
 0xe14   :  { %2472 = vmatmul.mubr.msk.f32.vlgmr.msra.gmra.mxu0 %vm165_vm0, %v3030_v48  ;;  %2477 = vmatpush3.msra.mxu1 %v2021_v17  ;;  %v2189_v48 = vld [vmem:[#allocation11 + $0x8] ss:$0 sm:$0xff] }
 0xe15   :  { %2478 = vmatprep.subr.mxu1 %v2020_v51 }
 0xe16   :  { %2479 = vmatpush3.msra.mxu1 %v2020_v51 }
 0xe17   :  { %2480 = vmatprep.subr.mxu1 %v2019_v31 }
 0xe18   :  { %2481 = vmatpush3.msra.mxu1 %v2019_v31 }
 0xed0   :  { %v2462_v32 = vpop.f32.mrf.mxu1 }
 0xed2   :  { %v1925_v36 = vpop.f32.mrf.mxu1 }
 0xed3   :  { %2482 = vmatprep.mubr.msk.f32.mxu1 %vm165_vm0, %v1925_v36 }
 0xed4   :  { %v2473_v38 = vpop.f32.mrf.mxu0  ;;  %2483 = vmatmul.mubr.msk.f32.vlgmr.msra.gmra.mxu1 %vm165_vm0, %v2462_v32 }
 0xed6   :  { %v2010_v15 = vpop.f32.mrf.mxu0 }
 0xed7   :  { %2485 = vmatprep.mubr.msk.f32.mxu1 %vm165_vm0, %v2010_v15 }
 0xed8   :  { %2486 = vmatmul.mubr.msk.f32.gmra.mxu1 %vm165_vm0, %v2473_v38 }
 0xf94   :  { %v2484_v0 = vpop.f32.mrf.mxu1 }
 0xf95   :  { %v2111_v1 = vadd.f32 %v2484_v0, %v2189_v48 }
 0xf96   :  { %v2105_v43 = vpop.f32.mrf.mxu1 }
 0xf97   :  { %2125 = vst [vmem:[#allocation16 + $0x8] sm:$0xff] %v2111_v1  ;;  %v2106_v2 = vadd.f32 %v2189_v48, %v2105_v43 }
 0xf98   :  { %v2487_v3 = vpop.f32.mrf.mxu1 }
 0xf99   :  { %2124 = vst [vmem:[#allocation16] sm:$0xff] %v2106_v2  ;;  %v2121_v4 = vadd.f32 %v2487_v3, %v2189_v48 }
 0xf9a   :  { %v2115_v5 = vpop.f32.mrf.mxu1 }
 0xf9b   :  { %2127 = vst [vmem:[#allocation16 + $0x18] sm:$0xff] %v2121_v4  ;;  %v2116_v6 = vadd.f32 %v2189_v48, %v2115_v5 }
 0xf9d   :  { %2126 = vst [vmem:[#allocation16 + $0x10] sm:$0xff] %v2116_v6 }
 0xf9e   :  { %2713 = shalt.err (!%p2710_p2)
}
 0xf9f   :  { %2139 = dma.vmem_to_hbm [thread:$0]  %s2134_s27, 512, %s3295_s9, [#allocation4], %s2736_s14, %s2736_s14, %s2737_s15  }
 0xfa0   :  { %2732 = dma.done.wait [#allocation4], 512  }
 0xfa1   :  { %2733 = vsyncadd [#allocation4], 4294966784 }
 0xfa2   :  { %2143 = vsyncpa [#allocation3], 1 }
 0xfa3   :  { %2144 = vsyncpa [#allocation6], 1 }
 0xfa4   :  { %2145 = vsyncpa [#allocation9], 1 }
 0xfa5   :  { %2146 = vsyncpa [#allocation12], 1 }
 0xfa6   :  { %2147 = vsyncpa [#allocation15], 1 }
 0xfa7   :  { %2148 = vsyncpa [#allocation4], 1 }

</bundles_post_ra>
